<compile_context>
chip_gen: v7x
topology: tpu7x:2x2x1
jax: 0.10.0
libtpu: 0.0.40
codegen_flags: <defaults>
</compile_context>

<pallas_src>
import jax
import jax.numpy as jnp
from jax.experimental import pallas as pl
from jax.experimental.pallas import tpu as pltpu


def _round_up(x, m):
    return ((x + m - 1) // m) * m


def poem_embed_kernel(emb_ref, scale_ref, wp_ref, bp_ref, wl_ref, bl_ref, out_ref):
    emb = emb_ref[...]        # [Bt, S, H] f32  (token embeddings for this batch tile)
    scale = scale_ref[...]    # [Bt, S, 1] f32  (mask / clamped token count, precomputed)

    # Masked mean pooling over the sequence axis: pure VPU multiply-add +
    # sublane reduction, no divide in-kernel (scale already carries 1/denom).
    feat = jnp.sum(emb * scale, axis=1)                                   # [Bt, H] f32

    # BERT pooler: tanh(feat @ W_p + b_p).  bf16 MXU inputs, f32 accumulate,
    # f32 bias add + tanh (EUP).
    pooled = jnp.tanh(
        jnp.dot(feat.astype(jnp.bfloat16), wp_ref[...],
                preferred_element_type=jnp.float32) + bp_ref[...]
    )                                                                     # [Bt, H] f32

    # Final projection: Linear(768 -> embed_dim).
    out = jnp.dot(pooled.astype(jnp.bfloat16), wl_ref[...],
                  preferred_element_type=jnp.float32) + bl_ref[...]       # [Bt, E] f32
    out_ref[...] = out.astype(out_ref.dtype)


def poem_embed(token_embeds, mask, w_pool, b_pool, w_lin, b_lin, *, block_b=None):
    """token_embeds: [B, S, 768] f32, mask: [B, S] f32 -> [B, embed_dim] f32."""
    B, S, H = token_embeds.shape
    E = w_lin.shape[1]

    # Batch tile: multiple of 8 sublanes.  For realistic batches raise this to
    # 128 (v5e) / 256 (v6e, v7x) to fill the MXU M dimension.
    if block_b is None:
        block_b = min(256, _round_up(B, 8))
    block_b = _round_up(block_b, 8)
    b_pad = _round_up(B, block_b)

    # Precompute the per-token pooling scale in the wrapper: mask / clamp(sum(mask), 1).
    denom = jnp.maximum(jnp.sum(mask, axis=1, keepdims=True), 1.0)        # [B, 1]
    scale = (mask.astype(jnp.float32) / denom)[..., None]                 # [B, S, 1]

    # Pad batch to a multiple of block_b (padded rows produce finite garbage,
    # sliced off at the end).
    if b_pad != B:
        pad = b_pad - B
        token_embeds = jnp.pad(token_embeds, ((0, pad), (0, 0), (0, 0)))
        scale = jnp.pad(scale, ((0, pad), (0, 0), (0, 0)))

    # bf16 weights for the MXU (halves weight bytes); f32 biases.
    wp = w_pool.astype(jnp.bfloat16)                                      # [H, H]
    wl = w_lin.astype(jnp.bfloat16)                                       # [H, E]
    bp = b_pool.reshape(1, H).astype(jnp.float32)
    bl = b_lin.reshape(1, E).astype(jnp.float32)

    grid = (b_pad // block_b,)
    out = pl.pallas_call(
        poem_embed_kernel,
        out_shape=jax.ShapeDtypeStruct((b_pad, E), jnp.float32),
        grid_spec=pltpu.PrefetchScalarGridSpec(
            num_scalar_prefetch=0,
            grid=grid,
            in_specs=[
                # Activations: one batch tile per grid step (double-buffered).
                pl.BlockSpec((block_b, S, H), lambda i: (i, 0, 0)),
                pl.BlockSpec((block_b, S, 1), lambda i: (i, 0, 0)),
                # Weights/biases: constant index_map -> DMA'd once, VMEM-resident.
                pl.BlockSpec((H, H), lambda i: (0, 0)),
                pl.BlockSpec((1, H), lambda i: (0, 0)),
                pl.BlockSpec((H, E), lambda i: (0, 0)),
                pl.BlockSpec((1, E), lambda i: (0, 0)),
            ],
            out_specs=pl.BlockSpec((block_b, E), lambda i: (i, 0)),
        ),
        compiler_params=pltpu.CompilerParams(
            dimension_semantics=("parallel",),
            # Above the 16/32 MiB scoped defaults, below v7x's 64 MiB physical.
            vmem_limit_bytes=48 * 1024 * 1024,
        ),
    )(token_embeds, scale, wp, bp, wl, bl)
    return out[:B]


def poem_embed_reference(token_embeds, mask, w_pool, b_pool, w_lin, b_lin):
    msum = jnp.sum(token_embeds * mask[..., None], axis=1)
    denom = jnp.maximum(jnp.sum(mask, axis=1, keepdims=True), 1.0)
    feat = msum / denom
    pooled = jnp.tanh(feat @ w_pool + b_pool)
    return pooled @ w_lin + b_lin


if __name__ == "__main__":
    H, E = 768, 512          # BERT hidden size, embed_dim (fixed by the module)
    VOCAB = 1000

    key = jax.random.PRNGKey(0)
    k_tab, k_wp, k_bp, k_wl, k_bl, k_ids1, k_ids2, k_len2 = jax.random.split(key, 8)

    # Deterministic synthetic parameters (shapes implied by the module).
    emb_table = jax.random.normal(k_tab, (VOCAB, H), jnp.float32) * 0.02
    w_pool = jax.random.normal(k_wp, (H, H), jnp.float32) * 0.02   # BERT pooler dense
    b_pool = jax.random.normal(k_bp, (1, H), jnp.float32) * 0.02
    w_lin = jax.random.normal(k_wl, (H, E), jnp.float32) * 0.02    # nn.Linear(768, embed_dim)
    b_lin = jax.random.normal(k_bl, (1, E), jnp.float32) * 0.02

    def run_case(k_ids, B, S, lengths, block_b=None):
        ids = jax.random.randint(k_ids, (B, S), 0, VOCAB, jnp.int32)
        mask = (jnp.arange(S)[None, :] < lengths[:, None]).astype(jnp.float32)  # [B, S]
        token_embeds = jnp.take(emb_table, ids, axis=0)                          # [B, S, H]
        out = poem_embed(token_embeds, mask, w_pool, b_pool, w_lin, b_lin,
                         block_b=block_b)
        out = jax.block_until_ready(out)
        ref = poem_embed_reference(token_embeds, mask, w_pool, b_pool, w_lin, b_lin)
        assert out.shape == (B, E)
        # bf16 MXU inputs vs. f32 reference -> looser tolerance.
        assert jnp.allclose(out, ref, rtol=2e-2, atol=2e-3), "mismatch vs reference"

    # Case 1: small batch (pads 2 -> 8, single grid step).
    run_case(k_ids1, B=2, S=8, lengths=jnp.array([8, 5], jnp.int32))

    # Case 2: unaligned batch with an explicit multi-step grid (pads 20 -> 24,
    # grid of 3 tiles) exercising resident weights + pipelined activation tiles.
    lens2 = jax.random.randint(k_len2, (20,), 1, 17, jnp.int32)
    run_case(k_ids2, B=20, S=16, lengths=lens2, block_b=8)

    print("KERNEL_OK")
</pallas_src>

<mosaic_0001>
module attributes {stable_mosaic.version = 11 : i64} {
  func.func @poem_embed_kernel(%arg0: i32, %arg1: memref<8x8x768xf32, #tpu.memory_space<vmem>>, %arg2: memref<8x8x1xf32, #tpu.memory_space<vmem>>, %arg3: memref<768x768xbf16, #tpu.memory_space<vmem>>, %arg4: memref<1x768xf32, #tpu.memory_space<vmem>>, %arg5: memref<768x512xbf16, #tpu.memory_space<vmem>>, %arg6: memref<1x512xf32, #tpu.memory_space<vmem>>, %arg7: memref<8x512xf32, #tpu.memory_space<vmem>>) attributes {dimension_semantics = [#tpu.dimension_semantics<parallel>], iteration_bounds = array<i64: 1>, scalar_prefetch = 0 : i64, scratch_operands = 0 : i64, tpu.core_type = #tpu.core_type<tc>, window_params = [{transform_indices = @transform_0, window_bounds = array<i64: 8, 8, 768>}, {transform_indices = @transform_1, window_bounds = array<i64: 8, 8, 1>}, {pipeline_mode = #tpu.pipeline_mode<synchronous>, transform_indices = @transform_2, window_bounds = array<i64: 768, 768>}, {pipeline_mode = #tpu.pipeline_mode<synchronous>, transform_indices = @transform_3, window_bounds = array<i64: 1, 768>}, {pipeline_mode = #tpu.pipeline_mode<synchronous>, transform_indices = @transform_4, window_bounds = array<i64: 768, 512>}, {pipeline_mode = #tpu.pipeline_mode<synchronous>, transform_indices = @transform_5, window_bounds = array<i64: 1, 512>}, {transform_indices = @transform_6, window_bounds = array<i64: 8, 512>}]} {
    %c0 = arith.constant 0 : index
    %c0_0 = arith.constant 0 : index
    %c0_1 = arith.constant 0 : index
    %0 = vector.load %arg1[%c0, %c0_0, %c0_1] : memref<8x8x768xf32, #tpu.memory_space<vmem>>, vector<8x8x768xf32>
    %c0_2 = arith.constant 0 : index
    %c0_3 = arith.constant 0 : index
    %c0_4 = arith.constant 0 : index
    %1 = vector.load %arg2[%c0_2, %c0_3, %c0_4] : memref<8x8x1xf32, #tpu.memory_space<vmem>>, vector<8x8x1xf32>
    %2 = vector.broadcast %1 : vector<8x8x1xf32> to vector<8x8x768xf32>
    %3 = arith.mulf %0, %2 : vector<8x8x768xf32>
    %cst = arith.constant dense<0.000000e+00> : vector<8x768xf32>
    %4 = vector.multi_reduction <add>, %3, %cst [1] : vector<8x8x768xf32> to vector<8x768xf32>
    %5 = arith.truncf %4 : vector<8x768xf32> to vector<8x768xbf16>
    %c0_5 = arith.constant 0 : index
    %c0_6 = arith.constant 0 : index
    %6 = vector.load %arg3[%c0_5, %c0_6] : memref<768x768xbf16, #tpu.memory_space<vmem>>, vector<768x768xbf16>
    %cst_7 = arith.constant dense<0.000000e+00> : vector<8x768xf32>
    %7 = tpu.matmul %5, %6, %cst_7 {dimension_numbers = #tpu.dot_dimension_numbers<[1], [0], [0], [1], [0, 0, 1, 1], [], []>} : vector<8x768xbf16>, vector<768x768xbf16>, vector<8x768xf32> -> vector<8x768xf32>
    %c0_8 = arith.constant 0 : index
    %c0_9 = arith.constant 0 : index
    %8 = vector.load %arg4[%c0_8, %c0_9] : memref<1x768xf32, #tpu.memory_space<vmem>>, vector<1x768xf32>
    %9 = vector.broadcast %8 : vector<1x768xf32> to vector<8x768xf32>
    %10 = arith.addf %7, %9 : vector<8x768xf32>
    %11 = math.tanh %10 : vector<8x768xf32>
    %12 = arith.truncf %11 : vector<8x768xf32> to vector<8x768xbf16>
    %c0_10 = arith.constant 0 : index
    %c0_11 = arith.constant 0 : index
    %13 = vector.load %arg5[%c0_10, %c0_11] : memref<768x512xbf16, #tpu.memory_space<vmem>>, vector<768x512xbf16>
    %cst_12 = arith.constant dense<0.000000e+00> : vector<8x512xf32>
    %14 = tpu.matmul %12, %13, %cst_12 {dimension_numbers = #tpu.dot_dimension_numbers<[1], [0], [0], [1], [0, 0, 1, 1], [], []>} : vector<8x768xbf16>, vector<768x512xbf16>, vector<8x512xf32> -> vector<8x512xf32>
    %c0_13 = arith.constant 0 : index
    %c0_14 = arith.constant 0 : index
    %15 = vector.load %arg6[%c0_13, %c0_14] : memref<1x512xf32, #tpu.memory_space<vmem>>, vector<1x512xf32>
    %16 = vector.broadcast %15 : vector<1x512xf32> to vector<8x512xf32>
    %17 = arith.addf %14, %16 : vector<8x512xf32>
    %c0_15 = arith.constant 0 : index
    %c0_16 = arith.constant 0 : index
    %18 = vector.load %arg7[%c0_15, %c0_16] : memref<8x512xf32, #tpu.memory_space<vmem>>, vector<8x512xf32>
    tpu.vector_store %arg7[%c0_15, %c0_16], %17 {strides = array<i32>} : memref<8x512xf32, #tpu.memory_space<vmem>>, vector<8x512xf32>,
    return
  }
  func.func @transform_0(%arg0: i32) -> (i32, i32, i32) {
    %c0_i32 = arith.constant 0 : i32
    %c0_i32_0 = arith.constant 0 : i32
    %c0_i32_1 = arith.constant 0 : i32
    return %arg0, %c0_i32, %c0_i32_0 : i32, i32, i32
  }
  func.func @transform_1(%arg0: i32) -> (i32, i32, i32) {
    %c0_i32 = arith.constant 0 : i32
    %c0_i32_0 = arith.constant 0 : i32
    %c0_i32_1 = arith.constant 0 : i32
    return %arg0, %c0_i32, %c0_i32_0 : i32, i32, i32
  }
  func.func @transform_2(%arg0: i32) -> (i32, i32) {
    %c0_i32 = arith.constant 0 : i32
    %c0_i32_0 = arith.constant 0 : i32
    %c0_i32_1 = arith.constant 0 : i32
    return %c0_i32, %c0_i32_0 : i32, i32
  }
  func.func @transform_3(%arg0: i32) -> (i32, i32) {
    %c0_i32 = arith.constant 0 : i32
    %c0_i32_0 = arith.constant 0 : i32
    %c0_i32_1 = arith.constant 0 : i32
    return %c0_i32, %c0_i32_0 : i32, i32
  }
  func.func @transform_4(%arg0: i32) -> (i32, i32) {
    %c0_i32 = arith.constant 0 : i32
    %c0_i32_0 = arith.constant 0 : i32
    %c0_i32_1 = arith.constant 0 : i32
    return %c0_i32, %c0_i32_0 : i32, i32
  }
  func.func @transform_5(%arg0: i32) -> (i32, i32) {
    %c0_i32 = arith.constant 0 : i32
    %c0_i32_0 = arith.constant 0 : i32
    %c0_i32_1 = arith.constant 0 : i32
    return %c0_i32, %c0_i32_0 : i32, i32
  }
  func.func @transform_6(%arg0: i32) -> (i32, i32) {
    %c0_i32 = arith.constant 0 : i32
    %c0_i32_0 = arith.constant 0 : i32
    return %arg0, %c0_i32 : i32, i32
  }
}

</mosaic_0001>

<bundles_post_ra>
// kernel: tpu_custom_call.1
= control target key start
LH: loop header
LB: loop body
LE: loop exit
PB: predicated region body
PF: predicated region fallthrough
CT: control target
= control target key end

     0   :  { %11 = vsyncpa [#allocation3], 0  ;;  %s6180_s0 = inlined_call_operand.hbm [shape: f32[8,8,768], index: 0, kind: input, shape index: {}]   ;;  %s6181_s1 = inlined_call_operand.vmem [shape: f32[8,8,1], index: 1, kind: input, shape index: {}]   ;;  %s6182_s2 = inlined_call_operand.hbm [shape: bf16[768,768], index: 2, kind: input, shape index: {}]   ;;  %s6183_s3 = inlined_call_operand.hbm [shape: f32[1,768], index: 3, kind: input, shape index: {}]   ;;  %s6184_s4 = inlined_call_operand.hbm [shape: bf16[768,512], index: 4, kind: input, shape index: {}]   ;;  %s6185_s5 = inlined_call_operand.hbm [shape: f32[1,512], index: 5, kind: input, shape index: {}]   ;;  %s6186_s6 = inlined_call_operand.hbm [shape: f32[8,512], index: 6, kind: output, shape index: {}]  }
   0x1   :  { %12 = vsyncpa [#allocation6], 0 }
   0x2   :  { %13 = vsyncpa [#allocation9], 0 }
   0x3   :  { %14 = vsyncpa [#allocation4], 0  ;;  %s5722_s21 = smov [#allocation5]   ;;  %s5582_s25 = scalar_lea.hbm %s6182_s2, 36864 }
   0x4   :  { %s34_s22 = sshll.u32 %s5722_s21, 4  ;;  %p5583_p0 = scmp.ne.s32.totalorder %s6182_s2, %s5582_s25  ;;  %s35_s22 = int_to_ptr.vmem [resolvable:$true] %s34_s22 }
   0x5   :  { %p5586_p1 = scmp.lt.u32.totalorder %s5582_s25, %s6182_s2 }
   0x7   :  { %p5588_p2 = pnand %p5586_p1, %p5583_p0 }
   0x9   :  { %5591 = shalt.err (!%p5588_p2)
}
   0xa   :  { %s5592_s30 = scalar_lea.vmem %s35_s22, 36864  ;;  %p5597_p4 = scmp.lt.s32.totalorder %s35_s22, %s35_s22 }
   0xb   :  { %p5593_p3 = scmp.ne.s32.totalorder %s35_s22, %s5592_s30  ;;  %p5598_p5 = scmp.lt.s32.totalorder %s5592_s30, %s5592_s30 }
   0xd   :  { %p5599_p6 = por %p5598_p5, %p5597_p4 }
   0xf   :  { %p5600_p7 = pnand %p5599_p6, %p5593_p3 }
  0x11   :  { %5603 = shalt.err (!%p5600_p7)
}
  0x12   :  { %s5723_s7 = smov 384   ;;  %s5724_s8 = smov 24  }
  0x13   :  { %40 = dma.hbm_to_vmem [thread:$0]  %s6182_s2, 36864, %s35_s22, [#allocation6], %s5723_s7, %s5723_s7, %s5724_s8  }
  0x14   :  { %s5725_s11 = smov [#allocation8]   ;;  %s5604_s15 = scalar_lea.hbm %s6184_s4, 24576 }
  0x15   :  { %s56_s12 = sshll.u32 %s5725_s11, 4  ;;  %p5605_p8 = scmp.ne.s32.totalorder %s6184_s4, %s5604_s15  ;;  %s57_s12 = int_to_ptr.vmem [resolvable:$true] %s56_s12 }
  0x16   :  { %p5608_p9 = scmp.lt.u32.totalorder %s5604_s15, %s6184_s4 }
  0x18   :  { %p5610_p10 = pnand %p5608_p9, %p5605_p8 }
  0x1a   :  { %5613 = shalt.err (!%p5610_p10)
}
  0x1b   :  { %s5614_s20 = scalar_lea.vmem %s57_s12, 24576  ;;  %p5619_p12 = scmp.lt.s32.totalorder %s57_s12, %s57_s12 }
  0x1c   :  { %p5615_p11 = scmp.ne.s32.totalorder %s57_s12, %s5614_s20  ;;  %p5620_p13 = scmp.lt.s32.totalorder %s5614_s20, %s5614_s20 }
  0x1e   :  { %p5621_p0 = por %p5620_p13, %p5619_p12 }
  0x20   :  { %p5622_p1 = pnand %p5621_p0, %p5615_p11 }
  0x22   :  { %5625 = shalt.err (!%p5622_p1)
}
  0x23   :  { %s5726_s2 = smov 256   ;;  %s5727_s21 = smov 16  }
  0x24   :  { %62 = dma.hbm_to_vmem [thread:$0]  %s6184_s4, 24576, %s57_s12, [#allocation9], %s5726_s2, %s5726_s2, %s5727_s21  }
  0x25   :  { %s5728_s24 = smov [#allocation2]   ;;  %s5626_s28 = scalar_lea.hbm %s6180_s0, 6144 }
  0x26   :  { %s20_s25 = sshll.u32 %s5728_s24, 4  ;;  %p5627_p2 = scmp.ne.s32.totalorder %s6180_s0, %s5626_s28  ;;  %s21_s25 = int_to_ptr.vmem [resolvable:$true] %s20_s25 }
  0x27   :  { %p5630_p3 = scmp.lt.u32.totalorder %s5626_s28, %s6180_s0 }
  0x29   :  { %p5632_p4 = pnand %p5630_p3, %p5627_p2 }
  0x2b   :  { %5635 = shalt.err (!%p5632_p4)
}
  0x2c   :  { %s5636_s9 = scalar_lea.vmem %s21_s25, 6144  ;;  %p5641_p6 = scmp.lt.s32.totalorder %s21_s25, %s21_s25 }
  0x2d   :  { %p5637_p5 = scmp.ne.s32.totalorder %s21_s25, %s5636_s9  ;;  %p5642_p7 = scmp.lt.s32.totalorder %s5636_s9, %s5636_s9 }
  0x2f   :  { %p5643_p8 = por %p5642_p7, %p5641_p6 }
  0x31   :  { %p5644_p9 = pnand %p5643_p8, %p5637_p5 }
  0x33   :  { %5647 = shalt.err (!%p5644_p9)
}
  0x34   :  { %s5729_s4 = smov 768   ;;  %s5730_s10 = smov 48  }
  0x35   :  { %26 = dma.hbm_to_vmem [thread:$0]  %s6180_s0, 6144, %s21_s25, [#allocation3], %s5729_s4, %s5729_s4, %s5730_s10  }
  0x36   :  { %s5731_s13 = smov [#allocation7]   ;;  %s5732_s15 = smov [#allocation10]  }
  0x37   :  { %s47_s14 = sshll.u32 %s5731_s13, 4  ;;  %s69_s16 = sshll.u32 %s5732_s15, 4  ;;  %s48_s14 = int_to_ptr.vmem [resolvable:$true] %s47_s14  ;;  %s70_s16 = int_to_ptr.vmem [resolvable:$true] %s69_s16 }
  0x38   :  { %s5648_s19 = scalar_lea.hbm %s6183_s3, 96 }
  0x39   :  { %p5649_p10 = scmp.ne.s32.totalorder %s6183_s3, %s5648_s19  ;;  %p5652_p11 = scmp.lt.u32.totalorder %s5648_s19, %s6183_s3 }
  0x3b   :  { %p5654_p12 = pnand %p5652_p11, %p5649_p10 }
  0x3d   :  { %5657 = shalt.err (!%p5654_p12)
}
  0x3e   :  { %s5658_s0 = scalar_lea.vmem %s48_s14, 96  ;;  %p5663_p0 = scmp.lt.s32.totalorder %s48_s14, %s48_s14 }
  0x3f   :  { %p5659_p13 = scmp.ne.s32.totalorder %s48_s14, %s5658_s0  ;;  %p5664_p1 = scmp.lt.s32.totalorder %s5658_s0, %s5658_s0 }
  0x41   :  { %p5665_p2 = por %p5664_p1, %p5663_p0 }
  0x43   :  { %p5666_p3 = pnand %p5665_p2, %p5659_p13 }
  0x45   :  { %5669 = shalt.err (!%p5666_p3)
}
  0x46   :  { %50 = dma.hbm_to_vmem [thread:$0]  %s6183_s3, 96, %s48_s14, [#allocation6]  }
  0x47   :  { %s5670_s27 = scalar_lea.hbm %s6185_s5, 64 }
  0x48   :  { %p5671_p4 = scmp.ne.s32.totalorder %s6185_s5, %s5670_s27  ;;  %p5674_p5 = scmp.lt.u32.totalorder %s5670_s27, %s6185_s5 }
  0x4a   :  { %p5676_p6 = pnand %p5674_p5, %p5671_p4 }
  0x4c   :  { %5679 = shalt.err (!%p5676_p6)
}
  0x4d   :  { %s5680_s8 = scalar_lea.vmem %s70_s16, 64  ;;  %p5685_p8 = scmp.lt.s32.totalorder %s70_s16, %s70_s16 }
  0x4e   :  { %p5681_p7 = scmp.ne.s32.totalorder %s70_s16, %s5680_s8  ;;  %p5686_p9 = scmp.lt.s32.totalorder %s5680_s8, %s5680_s8 }
  0x50   :  { %p5687_p10 = por %p5686_p9, %p5685_p8 }
  0x52   :  { %p5688_p11 = pnand %p5687_p10, %p5681_p7 }
  0x54   :  { %5691 = shalt.err (!%p5688_p11)
}
  0x55   :  { %72 = dma.hbm_to_vmem [thread:$0]  %s6185_s5, 64, %s70_s16, [#allocation9]  }
  0x56   :  { %5714 = dma.done.wait [#allocation3], 6144  }
  0x57   :  { %5715 = vsyncadd [#allocation3], 4294961152 }
  0x58   :  { %5716 = dma.done.wait [#allocation6], 36960  }
  0x59   :  { %5717 = vsyncadd [#allocation6], 4294930336 }
  0x5a   :  { %5718 = dma.done.wait [#allocation9], 24640  }
  0x5b   :  { %5719 = vsyncadd [#allocation9], 4294942656  ;;  %v5733_v0 = vmov 0   ;;  %v138_v1 = vld [vmem:[%s6181_s1 + $0x10] sm:$0xff]  ;;  %v136_v2 = vld [vmem:[%s6181_s1] sm:$0xff]  ;;  %vm984_vm0 = vcmask 1041409  }
  0x5c   :  { %4849 = vset.pattern.permute.xlu1 %v5733_v0  ;;  %4848 = vset.pattern.permute.xlu0 %v5733_v0  ;;  %v139_v3 = vld [vmem:[%s6181_s1 + $0x18] sm:$0xff]  ;;  %v137_v4 = vld [vmem:[%s6181_s1 + $0x8] sm:$0xff]  ;;  %v140_v7 = vld [vmem:[%s6181_s1 + $0x20] sm:$0xff]  ;;  %vm986_vm1 = vcmask 1042434   ;;  %vm988_vm2 = vcmask 1043459   ;;  %vm990_vm3 = vcmask 1044484  }
  0x5d   :  { %156 = vperm.xlu1 %4849, %v138_v1   ;;  %146 = vperm.xlu0 %4848, %v136_v2   ;;  %v4850_v5 = vld [vmem:[#allocation5 + $0x4] ss:$24 sps:$4 sm:$0xff]   ;;  %v141_v6 = vld [vmem:[%s6181_s1 + $0x28] sm:$0xff]  ;;  %v4854_v9 = vld [vmem:[#allocation5] ss:$24 sps:$4 sm:$0xff]   ;;  %vm992_vm4 = vcmask 1045509  }
  0x5e   :  { %v4852_v8 = vld [vmem:[#allocation5 + $0x304] ss:$24 sps:$4 sm:$0xff]   ;;  %v4855_v10 = vld [vmem:[#allocation5 + $0x300] ss:$24 sps:$4 sm:$0xff]   ;;  %2485 = vmatprep.subr.bf16.mxu1 %v4850_v5  ;;  %v4856_v11 = vld [vmem:[#allocation5 + $0x34] ss:$24 sps:$4 sm:$0xff]  }
  0x5f   :  { %2526 = vmatprep.subr.bf16.mxu0 %v4852_v8  ;;  %2486 = vmatpush1.bf16.msra.mxu1 %v4854_v9  ;;  %v4858_v12 = vld [vmem:[#allocation5 + $0x334] ss:$24 sps:$4 sm:$0xff]   ;;  %v4860_v13 = vld [vmem:[#allocation5 + $0x30] ss:$24 sps:$4 sm:$0xff]   ;;  %v143_v15 = vld [vmem:[%s6181_s1 + $0x38] sm:$0xff]  ;;  %vm994_vm5 = vcmask 1046534  }
  0x60   :  { %2527 = vmatpush1.bf16.msra.mxu0 %v4855_v10  ;;  %v4861_v14 = vld [vmem:[#allocation5 + $0x330] ss:$24 sps:$4 sm:$0xff]   ;;  %2487 = vmatprep.subr.bf16.mxu1 %v4856_v11  ;;  %v4862_v16 = vld [vmem:[#allocation5 + $0x64] ss:$24 sps:$4 sm:$0xff]   ;;  %v4866_v19 = vld [vmem:[#allocation5 + $0x60] ss:$24 sps:$4 sm:$0xff]  }
  0x61   :  { %161 = vperm.xlu1 %4849, %v139_v3   ;;  %151 = vperm.xlu0 %4848, %v137_v4   ;;  %v4864_v17 = vld [vmem:[#allocation5 + $0x364] ss:$24 sps:$4 sm:$0xff]   ;;  %v142_v18 = vld [vmem:[%s6181_s1 + $0x30] sm:$0xff]  ;;  %v4867_v20 = vld [vmem:[#allocation5 + $0x360] ss:$24 sps:$4 sm:$0xff]   ;;  %vm996_vm6 = vcmask 1047559  }
  0x62   :  { %2528 = vmatprep.subr.bf16.mxu0 %v4858_v12  ;;  %v4868_v21 = vld [vmem:[#allocation5 + $0x94] ss:$24 sps:$4 sm:$0xff]   ;;  %v4872_v23 = vld [vmem:[#allocation5 + $0x90] ss:$24 sps:$4 sm:$0xff]   ;;  %v4874_v25 = vld [vmem:[#allocation5 + $0xc4] ss:$24 sps:$4 sm:$0xff]  }
  0x63   :  { %2488 = vmatpush1.bf16.msra.mxu1 %v4860_v13  ;;  %v4870_v22 = vld [vmem:[#allocation5 + $0x394] ss:$24 sps:$4 sm:$0xff]   ;;  %v4873_v24 = vld [vmem:[#allocation5 + $0x390] ss:$24 sps:$4 sm:$0xff]   ;;  %v4876_v26 = vld [vmem:[#allocation5 + $0x3c4] ss:$24 sps:$4 sm:$0xff]  }
  0x64   :  { %2529 = vmatpush1.bf16.msra.mxu0 %v4861_v14  ;;  %2489 = vmatprep.subr.bf16.mxu1 %v4862_v16  ;;  %v4878_v27 = vld [vmem:[#allocation5 + $0xc0] ss:$24 sps:$4 sm:$0xff]   ;;  %v4880_v29 = vld [vmem:[#allocation5 + $0xf4] ss:$24 sps:$4 sm:$0xff]   ;;  %v4884_v31 = vld [vmem:[#allocation5 + $0xf0] ss:$24 sps:$4 sm:$0xff]  }
  0x65   :  { %171 = vperm.xlu1 %4849, %v141_v6   ;;  %166 = vperm.xlu0 %4848, %v140_v7   ;;  %v4879_v28 = vld [vmem:[#allocation5 + $0x3c0] ss:$24 sps:$4 sm:$0xff]   ;;  %v4882_v30 = vld [vmem:[#allocation5 + $0x3f4] ss:$24 sps:$4 sm:$0xff]   ;;  %v4885_v32 = vld [vmem:[#allocation5 + $0x3f0] ss:$24 sps:$4 sm:$0xff]  }
  0x66   :  { %2530 = vmatprep.subr.bf16.mxu0 %v4864_v17  ;;  %v4886_v33 = vld [vmem:[#allocation5 + $0x124] ss:$24 sps:$4 sm:$0xff]   ;;  %v4890_v35 = vld [vmem:[#allocation5 + $0x120] ss:$24 sps:$4 sm:$0xff]   ;;  %v4892_v37 = vld [vmem:[#allocation5 + $0x154] ss:$24 sps:$4 sm:$0xff]  }
  0x67   :  { %2490 = vmatpush1.bf16.msra.mxu1 %v4866_v19  ;;  %v4888_v34 = vld [vmem:[#allocation5 + $0x424] ss:$24 sps:$4 sm:$0xff]   ;;  %v4891_v36 = vld [vmem:[#allocation5 + $0x420] ss:$24 sps:$4 sm:$0xff]   ;;  %v4894_v38 = vld [vmem:[#allocation5 + $0x454] ss:$24 sps:$4 sm:$0xff]  }
  0x68   :  { %2531 = vmatpush1.bf16.msra.mxu0 %v4867_v20  ;;  %2491 = vmatprep.subr.bf16.mxu1 %v4868_v21  ;;  %v4896_v39 = vld [vmem:[#allocation5 + $0x150] ss:$24 sps:$4 sm:$0xff]   ;;  %v4898_v41 = vld [vmem:[#allocation5 + $0x184] ss:$24 sps:$4 sm:$0xff]   ;;  %v4902_v43 = vld [vmem:[#allocation5 + $0x180] ss:$24 sps:$4 sm:$0xff]  }
  0x69   :  { %181 = vperm.xlu1 %4849, %v143_v15   ;;  %176 = vperm.xlu0 %4848, %v142_v18   ;;  %v4897_v40 = vld [vmem:[#allocation5 + $0x450] ss:$24 sps:$4 sm:$0xff]   ;;  %v4900_v42 = vld [vmem:[#allocation5 + $0x484] ss:$24 sps:$4 sm:$0xff]   ;;  %v4903_v44 = vld [vmem:[#allocation5 + $0x480] ss:$24 sps:$4 sm:$0xff]  }
  0x6a   :  { %2532 = vmatprep.subr.bf16.mxu0 %v4870_v22  ;;  %v4904_v45 = vld [vmem:[#allocation5 + $0x1b4] ss:$24 sps:$4 sm:$0xff]   ;;  %v4908_v47 = vld [vmem:[#allocation5 + $0x1b0] ss:$24 sps:$4 sm:$0xff]   ;;  %v4910_v49 = vld [vmem:[#allocation5 + $0x1e4] ss:$24 sps:$4 sm:$0xff]  }
  0x6b   :  { %2492 = vmatpush1.bf16.msra.mxu1 %v4872_v23  ;;  %v4906_v46 = vld [vmem:[#allocation5 + $0x4b4] ss:$24 sps:$4 sm:$0xff]   ;;  %v4909_v48 = vld [vmem:[#allocation5 + $0x4b0] ss:$24 sps:$4 sm:$0xff]   ;;  %v4912_v50 = vld [vmem:[#allocation5 + $0x4e4] ss:$24 sps:$4 sm:$0xff]  }
  0x6c   :  { %2533 = vmatpush1.bf16.msra.mxu0 %v4873_v24  ;;  %2493 = vmatprep.subr.bf16.mxu1 %v4874_v25  ;;  %v4914_v51 = vld [vmem:[#allocation5 + $0x1e0] ss:$24 sps:$4 sm:$0xff]   ;;  %v4916_v53 = vld [vmem:[#allocation5 + $0x214] ss:$24 sps:$4 sm:$0xff]   ;;  %v4920_v55 = vld [vmem:[#allocation5 + $0x210] ss:$24 sps:$4 sm:$0xff]  }
  0x6d   :  { %2534 = vmatprep.subr.bf16.mxu0 %v4876_v26  ;;  %v4915_v52 = vld [vmem:[#allocation5 + $0x4e0] ss:$24 sps:$4 sm:$0xff]   ;;  %v4918_v54 = vld [vmem:[#allocation5 + $0x514] ss:$24 sps:$4 sm:$0xff]   ;;  %v4921_v56 = vld [vmem:[#allocation5 + $0x510] ss:$24 sps:$4 sm:$0xff]  }
  0x6e   :  { %v4922_v57 = vld [vmem:[#allocation5 + $0x244] ss:$24 sps:$4 sm:$0xff]   ;;  %v4926_v59 = vld [vmem:[#allocation5 + $0x240] ss:$24 sps:$4 sm:$0xff]   ;;  %v4928_v61 = vld [vmem:[#allocation5 + $0x274] ss:$24 sps:$4 sm:$0xff]  }
  0x6f   :  { %2494 = vmatpush1.bf16.msra.mxu1 %v4878_v27  ;;  %v4924_v58 = vld [vmem:[#allocation5 + $0x544] ss:$24 sps:$4 sm:$0xff]   ;;  %v4927_v60 = vld [vmem:[#allocation5 + $0x540] ss:$24 sps:$4 sm:$0xff]   ;;  %v4930_v62 = vld [vmem:[#allocation5 + $0x574] ss:$24 sps:$4 sm:$0xff]  }
  0x70   :  { %2535 = vmatpush1.bf16.msra.mxu0 %v4879_v28  ;;  %2495 = vmatprep.subr.bf16.mxu1 %v4880_v29  ;;  %v4932_v63 = vld [vmem:[#allocation5 + $0x270] ss:$24 sps:$4 sm:$0xff]   ;;  %v4934_v1 = vld [vmem:[#allocation5 + $0x2a4] ss:$24 sps:$4 sm:$0xff]   ;;  %v4938_v3 = vld [vmem:[#allocation5 + $0x2a0] ss:$24 sps:$4 sm:$0xff]  }
  0x71   :  { %2536 = vmatprep.subr.bf16.mxu0 %v4882_v30  ;;  %v4933_v0 = vld [vmem:[#allocation5 + $0x570] ss:$24 sps:$4 sm:$0xff]   ;;  %v4936_v2 = vld [vmem:[#allocation5 + $0x5a4] ss:$24 sps:$4 sm:$0xff]   ;;  %v4939_v4 = vld [vmem:[#allocation5 + $0x5a0] ss:$24 sps:$4 sm:$0xff]  }
  0x72   :  { %v4940_v5 = vld [vmem:[#allocation5 + $0x2d4] ss:$24 sps:$4 sm:$0xff]   ;;  %v4944_v7 = vld [vmem:[#allocation5 + $0x2d0] ss:$24 sps:$4 sm:$0xff]   ;;  %v4948_v9 = vld [vmem:[#allocation5 + $0x604] ss:$24 sps:$4 sm:$0xff]  }
  0x73   :  { %2496 = vmatpush1.bf16.msra.mxu1 %v4884_v31  ;;  %v4942_v6 = vld [vmem:[#allocation5 + $0x5d4] ss:$24 sps:$4 sm:$0xff]   ;;  %v4945_v8 = vld [vmem:[#allocation5 + $0x5d0] ss:$24 sps:$4 sm:$0xff]   ;;  %v100_v11 = vld [vmem:[#allocation2 + $0x60] sm:$0xff]  ;;  %s5734_s1 = smov [#allocation11]  }
  0x74   :  { %2537 = vmatpush1.bf16.msra.mxu0 %v4885_v32  ;;  %2497 = vmatprep.subr.bf16.mxu1 %v4886_v33  ;;  %v4951_v10 = vld [vmem:[#allocation5 + $0xc] ss:$24 sps:$4 sm:$0xff]   ;;  %v102_v13 = vld [vmem:[#allocation2 + $0x70] sm:$0xff]  ;;  %v103_v14 = vld [vmem:[#allocation2 + $0x78] sm:$0xff]  ;;  %s4296_s0 = sshll.u32 %s5734_s1, 4  ;;  %s4297_s0 = int_to_ptr.vmem [resolvable:$true] %s4296_s0 }
  0x75   :  { %2538 = vmatprep.subr.bf16.mxu0 %v4888_v34  ;;  %v101_v12 = vld [vmem:[#allocation2 + $0x68] sm:$0xff]  ;;  %v104_v15 = vld [vmem:[#allocation2 + $0x80] sm:$0xff]  ;;  %v90_v25 = vld [vmem:[#allocation2 + $0x10] sm:$0xff]  ;;  %s5692_s23 = scalar_lea.vmem %s4297_s0, 512  ;;  %p5697_p13 = scmp.lt.s32.totalorder %s4297_s0, %s4297_s0 }
  0x76   :  { %v105_v16 = vld [vmem:[#allocation2 + $0x88] sm:$0xff]  ;;  %v88_v17 = vld [vmem:[#allocation2] sm:$0xff]  ;;  %v91_v26 = vld [vmem:[#allocation2 + $0x18] sm:$0xff]  ;;  %p5693_p12 = scmp.ne.s32.totalorder %s4297_s0, %s5692_s23  ;;  %p5698_p0 = scmp.lt.s32.totalorder %s5692_s23, %s5692_s23 }
  0x77   :  { %2498 = vmatpush1.bf16.msra.mxu1 %v4890_v35  ;;  %v89_v18 = vld [vmem:[#allocation2 + $0x8] sm:$0xff]  ;;  %v92_v29 = vld [vmem:[#allocation2 + $0x20] sm:$0xff] }
  0x78   :  { %2539 = vmatpush1.bf16.msra.mxu0 %v4891_v36  ;;  %2499 = vmatprep.subr.bf16.mxu1 %v4892_v37  ;;  %v93_v30 = vld [vmem:[#allocation2 + $0x28] sm:$0xff]  ;;  %p5699_p1 = por %p5698_p0, %p5697_p13 }
  0x79   :  { %2540 = vmatprep.subr.bf16.mxu0 %v4894_v38 }
  0x7a   :  { %p5700_p2 = pnand %p5699_p1, %p5693_p12 }
  0x7b   :  { %2500 = vmatpush1.bf16.msra.mxu1 %v4896_v39 }
  0x7c   :  { %2541 = vmatpush1.bf16.msra.mxu0 %v4897_v40  ;;  %2501 = vmatprep.subr.bf16.mxu1 %v4898_v41 }
  0x7d   :  { %2542 = vmatprep.subr.bf16.mxu0 %v4900_v42 }
  0x7f   :  { %2502 = vmatpush1.bf16.msra.mxu1 %v4902_v43 }
  0x80   :  { %2543 = vmatpush1.bf16.msra.mxu0 %v4903_v44  ;;  %2503 = vmatprep.subr.bf16.mxu1 %v4904_v45 }
  0x81   :  { %2544 = vmatprep.subr.bf16.mxu0 %v4906_v46 }
  0x83   :  { %2504 = vmatpush1.bf16.msra.mxu1 %v4908_v47 }
  0x84   :  { %2545 = vmatpush1.bf16.msra.mxu0 %v4909_v48  ;;  %2505 = vmatprep.subr.bf16.mxu1 %v4910_v49 }
  0x85   :  { %2546 = vmatprep.subr.bf16.mxu0 %v4912_v50 }
  0x87   :  { %2506 = vmatpush1.bf16.msra.mxu1 %v4914_v51 }
  0x88   :  { %2547 = vmatpush1.bf16.msra.mxu0 %v4915_v52  ;;  %2507 = vmatprep.subr.bf16.mxu1 %v4916_v53 }
  0x89   :  { %2548 = vmatprep.subr.bf16.mxu0 %v4918_v54 }
  0x8b   :  { %2508 = vmatpush1.bf16.msra.mxu1 %v4920_v55 }
  0x8c   :  { %2549 = vmatpush1.bf16.msra.mxu0 %v4921_v56  ;;  %2509 = vmatprep.subr.bf16.mxu1 %v4922_v57 }
  0x8d   :  { %2550 = vmatprep.subr.bf16.mxu0 %v4924_v58 }
  0x8f   :  { %2510 = vmatpush1.bf16.msra.mxu1 %v4926_v59 }
  0x90   :  { %2551 = vmatpush1.bf16.msra.mxu0 %v4927_v60  ;;  %2511 = vmatprep.subr.bf16.mxu1 %v4928_v61 }
  0x91   :  { %2552 = vmatprep.subr.bf16.mxu0 %v4930_v62 }
  0x93   :  { %2512 = vmatpush1.bf16.msra.mxu1 %v4932_v63 }
  0x94   :  { %2553 = vmatpush1.bf16.msra.mxu0 %v4933_v0  ;;  %2513 = vmatprep.subr.bf16.mxu1 %v4934_v1 }
  0x95   :  { %2554 = vmatprep.subr.bf16.mxu0 %v4936_v2 }
  0x97   :  { %2514 = vmatpush1.bf16.msra.mxu1 %v4938_v3 }
  0x98   :  { %2555 = vmatpush1.bf16.msra.mxu0 %v4939_v4  ;;  %2515 = vmatprep.subr.bf16.mxu1 %v4940_v5 }
  0x99   :  { %2556 = vmatprep.subr.bf16.mxu0 %v4942_v6 }
  0x9b   :  { %2516 = vmatpush1.bf16.msra.mxu1 %v4944_v7 }
  0x9c   :  { %2557 = vmatpush1.bf16.msra.mxu0 %v4945_v8  ;;  %2608 = vmatprep.subr.bf16.mxu1 %v4951_v10 }
  0x9d   :  { %2567 = vmatprep.subr.bf16.mxu0 %v4948_v9 }
  0xdc   :  { %v157_v19 = vpop.permute.xlu1 %156  ;;  %v147_v20 = vpop.permute.xlu0 %146 }
  0xdd   :  { %v196_v21 = vmul.f32 %v157_v19, %v100_v11  ;;  %v197_v22 = vmul.f32 %v157_v19, %v101_v12  ;;  %v198_v23 = vmul.f32 %v157_v19, %v102_v13  ;;  %v199_v24 = vmul.f32 %v157_v19, %v103_v14 }
  0xde   :  { %v200_v27 = vmul.f32 %v157_v19, %v104_v15  ;;  %v201_v28 = vmul.f32 %v157_v19, %v105_v16  ;;  %v184_v31 = vmul.f32 %v147_v20, %v88_v17  ;;  %v185_v32 = vmul.f32 %v147_v20, %v89_v18 }
  0xdf   :  { %v304_v33 = vrot.slane %v196_v21, 4  ;;  %v310_v34 = vrot.slane %v197_v22, 4  ;;  %v316_v35 = vrot.slane %v198_v23, 4  ;;  %v322_v36 = vrot.slane %v199_v24, 4 }
  0xe0   :  { %v328_v37 = vrot.slane %v200_v27, 4  ;;  %v334_v38 = vrot.slane %v201_v28, 4  ;;  %v5854_v39 = vmul.f32 %v147_v20, %v90_v25  ;;  %v5856_v40 = vmul.f32 %v147_v20, %v91_v26 }
  0xe1   :  { %v305_v41 = vadd.f32 %v304_v33, %v196_v21  ;;  %v311_v42 = vadd.f32 %v310_v34, %v197_v22  ;;  %v317_v43 = vadd.f32 %v316_v35, %v198_v23  ;;  %v323_v44 = vadd.f32 %v322_v36, %v199_v24  ;;  %v108_v35 = vld [vmem:[#allocation2 + $0xa0] sm:$0xff]  ;;  %v109_v36 = vld [vmem:[#allocation2 + $0xa8] sm:$0xff] }
  0xe2   :  { %v329_v45 = vadd.f32 %v328_v37, %v200_v27  ;;  %v335_v46 = vadd.f32 %v334_v38, %v201_v28  ;;  %v5858_v47 = vmul.f32 %v147_v20, %v92_v29  ;;  %v5860_v48 = vmul.f32 %v147_v20, %v93_v30  ;;  %v162_v28 = vpop.permute.xlu1 %161  ;;  %v106_v29 = vld [vmem:[#allocation2 + $0x90] sm:$0xff]  ;;  %v107_v30 = vld [vmem:[#allocation2 + $0x98] sm:$0xff] }
  0xe3   :  { %v306_v49 = vrot.slane %v305_v41, 2  ;;  %v312_v50 = vrot.slane %v311_v42, 2  ;;  %v318_v51 = vrot.slane %v317_v43, 2  ;;  %v324_v52 = vrot.slane %v323_v44, 2 }
  0xe4   :  { %v330_v53 = vrot.slane %v329_v45, 2  ;;  %v336_v54 = vrot.slane %v335_v46, 2  ;;  %v232_v55 = vrot.slane %v184_v31, 4  ;;  %v238_v56 = vrot.slane %v185_v32, 4 }
  0xe5   :  { %v307_v57 = vadd.f32 %v306_v49, %v305_v41  ;;  %v313_v58 = vadd.f32 %v312_v50, %v311_v42  ;;  %v319_v59 = vadd.f32 %v318_v51, %v317_v43  ;;  %v325_v60 = vadd.f32 %v324_v52, %v323_v44 }
  0xe6   :  { %v331_v61 = vadd.f32 %v330_v53, %v329_v45  ;;  %v337_v62 = vadd.f32 %v336_v54, %v335_v46  ;;  %v233_v63 = vadd.f32 %v232_v55, %v184_v31  ;;  %v239_v0 = vadd.f32 %v238_v56, %v185_v32  ;;  %v110_v53 = vld [vmem:[#allocation2 + $0xb0] sm:$0xff]  ;;  %v111_v54 = vld [vmem:[#allocation2 + $0xb8] sm:$0xff] }
  0xe7   :  { %v308_v1 = vrot.slane %v307_v57, 1  ;;  %v314_v2 = vrot.slane %v313_v58, 1  ;;  %v320_v3 = vrot.slane %v319_v59, 1  ;;  %v326_v4 = vrot.slane %v325_v60, 1 }
  0xe8   :  { %v332_v5 = vrot.slane %v331_v61, 1  ;;  %v338_v6 = vrot.slane %v337_v62, 1  ;;  %v234_v7 = vrot.slane %v233_v63, 2  ;;  %v240_v8 = vrot.slane %v239_v0, 2 }
  0xe9   :  { %v309_v9 = vadd.f32 %v308_v1, %v307_v57  ;;  %v315_v10 = vadd.f32 %v314_v2, %v313_v58  ;;  %v321_v11 = vadd.f32 %v320_v3, %v319_v59  ;;  %v327_v12 = vadd.f32 %v326_v4, %v325_v60 }
  0xea   :  { %v333_v13 = vadd.f32 %v332_v5, %v331_v61  ;;  %v339_v14 = vadd.f32 %v338_v6, %v337_v62  ;;  %v235_v15 = vadd.f32 %v234_v7, %v233_v63  ;;  %v241_v16 = vadd.f32 %v240_v8, %v239_v0 }
  0xeb   :  { %v532_v17 = vpack.c.bf16 %v309_v9, %v309_v9  ;;  %v533_v18 = vpack.c.bf16 %v315_v10, %v315_v10  ;;  %v534_v19 = vpack.c.bf16 %v321_v11, %v321_v11  ;;  %v535_v20 = vpack.c.bf16 %v327_v12, %v327_v12 }
  0xec   :  { %v536_v21 = vpack.c.bf16 %v333_v13, %v333_v13  ;;  %v537_v22 = vpack.c.bf16 %v339_v14, %v339_v14  ;;  %v236_v23 = vrot.slane %v235_v15, 1  ;;  %v242_v24 = vrot.slane %v241_v16, 1 }
  0xed   :  { %v5862_v25 = vunpack.c.l.b16 %v532_v17  ;;  %v5864_v26 = vunpack.c.l.b16 %v533_v18  ;;  %v5866_v27 = vunpack.c.l.b16 %v534_v19  ;;  %v5868_v31 = vunpack.c.l.b16 %v535_v20 }
  0xee   :  { %v5870_v32 = vunpack.c.l.b16 %v536_v21  ;;  %v237_v33 = vadd.f32 %v236_v23, %v235_v15  ;;  %v5872_v34 = vadd.f32 %v242_v24, %v241_v16  ;;  %v244_v37 = vrot.slane %v5854_v39, 4  ;;  %v94_v23 = vld [vmem:[#allocation2 + $0x30] sm:$0xff]  ;;  %v95_v24 = vld [vmem:[#allocation2 + $0x38] sm:$0xff] }
  0xef   :  { %v250_v38 = vrot.slane %v5856_v40, 4  ;;  %v256_v41 = vrot.slane %v5858_v47, 4  ;;  %v262_v42 = vrot.slane %v5860_v48, 4  ;;  %v5878_v43 = vunpack.c.l.b16 %v537_v22 }
  0xf0   :  { %6189 = vst [vmem:[#allocation16_spill] sm:$0xff] %v5870_v32  ;;  %v520_v44 = vpack.c.bf16 %v237_v33, %v237_v33  ;;  %v202_v45 = vmul.f32 %v162_v28, %v106_v29  ;;  %v203_v46 = vmul.f32 %v162_v28, %v107_v30  ;;  %v245_v49 = vadd.f32 %v244_v37, %v5854_v39  ;;  %v135_v32 = vld [vmem:[#allocation2 + $0x178] sm:$0xff] }
  0xf1   :  { %v251_v50 = vadd.f32 %v250_v38, %v5856_v40  ;;  %v257_v51 = vadd.f32 %v256_v41, %v5858_v47  ;;  %v263_v52 = vadd.f32 %v262_v42, %v5860_v48  ;;  %v521_v55 = vpack.c.bf16 %v5872_v34, %v5872_v34  ;;  %v152_v38 = vpop.permute.xlu0 %151 }
  0xf2   :  { %v5886_v56 = vunpack.c.l.b16 %v520_v44  ;;  %v204_v57 = vmul.f32 %v162_v28, %v108_v35  ;;  %v205_v58 = vmul.f32 %v162_v28, %v109_v36  ;;  %v246_v59 = vrot.slane %v245_v49, 2 }
  0xf3   :  { %v252_v60 = vrot.slane %v251_v50, 2  ;;  %v258_v61 = vrot.slane %v257_v51, 2  ;;  %v264_v62 = vrot.slane %v263_v52, 2  ;;  %v206_v39 = vmul.f32 %v162_v28, %v110_v53 }
  0xf4   :  { %v207_v63 = vmul.f32 %v162_v28, %v111_v54  ;;  %v340_v40 = vrot.slane %v202_v45, 4  ;;  %v346_v0 = vrot.slane %v203_v46, 4  ;;  %v247_v47 = vadd.f32 %v246_v59, %v245_v49  ;;  %v97_v49 = vld [vmem:[#allocation2 + $0x48] sm:$0xff]  ;;  %v98_v54 = vld [vmem:[#allocation2 + $0x50] sm:$0xff] }
  0xf5   :  { %v253_v1 = vadd.f32 %v252_v60, %v251_v50  ;;  %v259_v48 = vadd.f32 %v258_v61, %v257_v51  ;;  %v265_v2 = vadd.f32 %v264_v62, %v263_v52  ;;  %v352_v5 = vrot.slane %v204_v57, 4 }
  0xf6   :  { %v341_v3 = vadd.f32 %v340_v40, %v202_v45  ;;  %v347_v4 = vadd.f32 %v346_v0, %v203_v46  ;;  %v358_v6 = vrot.slane %v205_v58, 4  ;;  %v248_v7 = vrot.slane %v247_v47, 1  ;;  %v96_v46 = vld [vmem:[#allocation2 + $0x40] sm:$0xff] }
  0xf7   :  { %v254_v8 = vrot.slane %v253_v1, 1  ;;  %v260_v9 = vrot.slane %v259_v48, 1  ;;  %v266_v10 = vrot.slane %v265_v2, 1  ;;  %v353_v13 = vadd.f32 %v352_v5, %v204_v57  ;;  %v99_v57 = vld [vmem:[#allocation2 + $0x58] sm:$0xff] }
  0xf8   :  { %v342_v11 = vrot.slane %v341_v3, 2  ;;  %v348_v12 = vrot.slane %v347_v4, 2  ;;  %v359_v14 = vadd.f32 %v358_v6, %v205_v58  ;;  %v249_v15 = vadd.f32 %v248_v7, %v247_v47 }
  0xf9   :  { %v255_v16 = vadd.f32 %v254_v8, %v253_v1  ;;  %v261_v17 = vadd.f32 %v260_v9, %v259_v48  ;;  %v267_v18 = vadd.f32 %v266_v10, %v265_v2  ;;  %v354_v21 = vrot.slane %v353_v13, 2 }
  0xfa   :  { %v343_v19 = vadd.f32 %v342_v11, %v341_v3  ;;  %v349_v20 = vadd.f32 %v348_v12, %v347_v4  ;;  %v360_v22 = vrot.slane %v359_v14, 2  ;;  %v522_v28 = vpack.c.bf16 %v249_v15, %v249_v15 }
  0xfb   :  { %v523_v29 = vpack.c.bf16 %v255_v16, %v255_v16  ;;  %v524_v30 = vpack.c.bf16 %v261_v17, %v261_v17  ;;  %v525_v33 = vpack.c.bf16 %v267_v18, %v267_v18  ;;  %v355_v36 = vadd.f32 %v354_v21, %v353_v13 }
  0xfc   :  { %v344_v34 = vrot.slane %v343_v19, 1  ;;  %v350_v35 = vrot.slane %v349_v20, 1  ;;  %v361_v37 = vadd.f32 %v360_v22, %v359_v14  ;;  %v5888_v41 = vunpack.c.l.b16 %v521_v55 }
  0xfd   :  { %v5890_v42 = vunpack.c.l.b16 %v522_v28  ;;  %v5892_v44 = vunpack.c.l.b16 %v523_v29  ;;  %v5894_v45 = vunpack.c.l.b16 %v524_v30  ;;  %v5896_v50 = vunpack.c.l.b16 %v525_v33 }
  0xfe   :  { %v5898_v51 = vadd.f32 %v344_v34, %v343_v19  ;;  %v5900_v52 = vadd.f32 %v350_v35, %v349_v20  ;;  %v356_v53 = vrot.slane %v355_v36, 1  ;;  %v364_v58 = vrot.slane %v206_v39, 4 }
  0xff   :  { %6190 = vst [vmem:[#allocation17_spill] sm:$0xff] %v5894_v45  ;;  %v370_v55 = vrot.slane %v207_v63, 4  ;;  %v190_v59 = vmul.f32 %v152_v38, %v94_v23  ;;  %v191_v60 = vmul.f32 %v152_v38, %v95_v24  ;;  %v362_v62 = vrot.slane %v361_v37, 1 }
 0x100   :  { %v5902_v61 = vadd.f32 %v356_v53, %v355_v36  ;;  %v192_v40 = vmul.f32 %v152_v38, %v96_v46  ;;  %v193_v0 = vmul.f32 %v152_v38, %v97_v49  ;;  %v365_v47 = vadd.f32 %v364_v58, %v206_v39  ;;  %v118_v46 = vld [vmem:[#allocation2 + $0xf0] sm:$0xff]  ;;  %v172_v58 = vpop.permute.xlu1 %171 }
 0x101   :  { %v371_v1 = vadd.f32 %v370_v55, %v207_v63  ;;  %v194_v48 = vmul.f32 %v152_v38, %v98_v54  ;;  %v195_v2 = vmul.f32 %v152_v38, %v99_v57  ;;  %v268_v3 = vrot.slane %v190_v59, 4  ;;  %v119_v55 = vld [vmem:[#allocation2 + $0xf8] sm:$0xff] }
 0x102   :  { %v274_v4 = vrot.slane %v191_v60, 4  ;;  %v280_v5 = vrot.slane %v192_v40, 4  ;;  %v286_v6 = vrot.slane %v193_v0, 4  ;;  %v366_v7 = vrot.slane %v365_v47, 2 }
 0x103   :  { %v372_v8 = vrot.slane %v371_v1, 2  ;;  %v292_v9 = vrot.slane %v194_v48, 4  ;;  %v298_v10 = vrot.slane %v195_v2, 4  ;;  %v269_v11 = vadd.f32 %v268_v3, %v190_v59  ;;  %v120_v59 = vld [vmem:[#allocation2 + $0x100] sm:$0xff]  ;;  %v122_v3 = vld [vmem:[#allocation2 + $0x110] sm:$0xff] }
 0x104   :  { %v275_v12 = vadd.f32 %v274_v4, %v191_v60  ;;  %v281_v13 = vadd.f32 %v280_v5, %v192_v40  ;;  %v287_v14 = vadd.f32 %v286_v6, %v193_v0  ;;  %v367_v15 = vadd.f32 %v366_v7, %v365_v47  ;;  %v123_v4 = vld [vmem:[#allocation2 + $0x118] sm:$0xff] }
 0x105   :  { %v373_v16 = vadd.f32 %v372_v8, %v371_v1  ;;  %v293_v17 = vadd.f32 %v292_v9, %v194_v48  ;;  %v299_v18 = vadd.f32 %v298_v10, %v195_v2  ;;  %v270_v39 = vrot.slane %v269_v11, 2  ;;  %v121_v1 = vld [vmem:[#allocation2 + $0x108] sm:$0xff] }
 0x106   :  { %v276_v63 = vrot.slane %v275_v12, 2  ;;  %v282_v19 = vrot.slane %v281_v13, 2  ;;  %v288_v20 = vrot.slane %v287_v14, 2  ;;  %v368_v21 = vrot.slane %v367_v15, 1 }
 0x107   :  { %v374_v22 = vrot.slane %v373_v16, 1  ;;  %v294_v23 = vrot.slane %v293_v17, 2  ;;  %v300_v24 = vrot.slane %v299_v18, 2  ;;  %v271_v28 = vadd.f32 %v270_v39, %v269_v11 }
 0x108   :  { %v277_v29 = vadd.f32 %v276_v63, %v275_v12  ;;  %v283_v30 = vadd.f32 %v282_v19, %v281_v13  ;;  %v289_v33 = vadd.f32 %v288_v20, %v287_v14  ;;  %v5904_v34 = vadd.f32 %v362_v62, %v361_v37  ;;  %v167_v19 = vpop.permute.xlu0 %166  ;;  %v112_v20 = vld [vmem:[#allocation2 + $0xc0] sm:$0xff] }
 0x109   :  { %v369_v35 = vadd.f32 %v368_v21, %v367_v15  ;;  %v295_v36 = vadd.f32 %v294_v23, %v293_v17  ;;  %v301_v38 = vadd.f32 %v300_v24, %v299_v18  ;;  %v272_v49 = vrot.slane %v271_v28, 1  ;;  %v113_v21 = vld [vmem:[#allocation2 + $0xc8] sm:$0xff] }
 0x10a   :  { %v278_v53 = vrot.slane %v277_v29, 1  ;;  %v284_v54 = vrot.slane %v283_v30, 1  ;;  %v290_v57 = vrot.slane %v289_v33, 1  ;;  %v5906_v60 = vadd.f32 %v374_v22, %v373_v16 }
 0x10b   :  { %v542_v40 = vpack.c.bf16 %v369_v35, %v369_v35  ;;  %v296_v0 = vrot.slane %v295_v36, 1  ;;  %v302_v47 = vrot.slane %v301_v38, 1  ;;  %v273_v48 = vadd.f32 %v272_v49, %v271_v28 }
 0x10c   :  { %v279_v37 = vadd.f32 %v278_v53, %v277_v29  ;;  %v285_v62 = vadd.f32 %v284_v54, %v283_v30  ;;  %v291_v2 = vadd.f32 %v290_v57, %v289_v33  ;;  %v214_v7 = vmul.f32 %v172_v58, %v118_v46  ;;  %v114_v29 = vld [vmem:[#allocation2 + $0xd0] sm:$0xff]  ;;  %v116_v46 = vld [vmem:[#allocation2 + $0xe0] sm:$0xff]  ;;  %v117_v54 = vld [vmem:[#allocation2 + $0xe8] sm:$0xff] }
 0x10d   :  { %v297_v5 = vadd.f32 %v296_v0, %v295_v36  ;;  %v303_v6 = vadd.f32 %v302_v47, %v301_v38  ;;  %v215_v8 = vmul.f32 %v172_v58, %v119_v55  ;;  %v526_v9 = vpack.c.bf16 %v273_v48, %v273_v48  ;;  %v115_v38 = vld [vmem:[#allocation2 + $0xd8] sm:$0xff] }
 0x10e   :  { %v527_v10 = vpack.c.bf16 %v279_v37, %v279_v37  ;;  %v528_v11 = vpack.c.bf16 %v285_v62, %v285_v62  ;;  %v529_v12 = vpack.c.bf16 %v291_v2, %v291_v2  ;;  %v5908_v13 = vunpack.c.l.b16 %v542_v40 }
 0x10f   :  { %v530_v14 = vpack.c.bf16 %v297_v5, %v297_v5  ;;  %v216_v15 = vmul.f32 %v172_v58, %v120_v59  ;;  %v217_v16 = vmul.f32 %v172_v58, %v121_v1  ;;  %v531_v17 = vpack.c.bf16 %v303_v6, %v303_v6  ;;  %v130_v5 = vld [vmem:[#allocation2 + $0x150] sm:$0xff] }
 0x110   :  { %6191 = vst [vmem:[#allocation18_spill] sm:$0xff] %v5908_v13  ;;  %v5910_v18 = vunpack.c.l.b16 %v526_v9  ;;  %v5912_v39 = vunpack.c.l.b16 %v527_v10  ;;  %v5914_v63 = vunpack.c.l.b16 %v528_v11  ;;  %v5916_v22 = vunpack.c.l.b16 %v529_v12 }
 0x111   :  { %v5918_v23 = vunpack.c.l.b16 %v530_v14  ;;  %v218_v24 = vmul.f32 %v172_v58, %v122_v3  ;;  %v219_v28 = vmul.f32 %v172_v58, %v123_v4  ;;  %v412_v30 = vrot.slane %v214_v7, 4 }
 0x112   :  { %v418_v33 = vrot.slane %v215_v8, 4  ;;  %v424_v35 = vrot.slane %v216_v15, 4  ;;  %v430_v36 = vrot.slane %v217_v16, 4  ;;  %v208_v57 = vmul.f32 %v167_v19, %v112_v20 }
 0x113   :  { %6192 = vst [vmem:[#allocation19_spill] sm:$0xff] %v5918_v23  ;;  %v436_v49 = vrot.slane %v218_v24, 4  ;;  %v442_v53 = vrot.slane %v219_v28, 4  ;;  %v209_v55 = vmul.f32 %v167_v19, %v113_v21  ;;  %v413_v59 = vadd.f32 %v412_v30, %v214_v7 }
 0x114   :  { %v419_v40 = vadd.f32 %v418_v33, %v215_v8  ;;  %v425_v0 = vadd.f32 %v424_v35, %v216_v15  ;;  %v431_v47 = vadd.f32 %v430_v36, %v217_v16  ;;  %v210_v37 = vmul.f32 %v167_v19, %v114_v29  ;;  %v182_v15 = vpop.permute.xlu1 %181  ;;  %v133_v35 = vld [vmem:[#allocation2 + $0x168] sm:$0xff] }
 0x115   :  { %v437_v1 = vadd.f32 %v436_v49, %v218_v24  ;;  %v443_v48 = vadd.f32 %v442_v53, %v219_v28  ;;  %v211_v58 = vmul.f32 %v167_v19, %v115_v38  ;;  %v414_v62 = vrot.slane %v413_v59, 2  ;;  %v131_v28 = vld [vmem:[#allocation2 + $0x158] sm:$0xff]  ;;  %v134_v49 = vld [vmem:[#allocation2 + $0x170] sm:$0xff] }
 0x116   :  { %v420_v2 = vrot.slane %v419_v40, 2  ;;  %v426_v3 = vrot.slane %v425_v0, 2  ;;  %v432_v4 = vrot.slane %v431_v47, 2  ;;  %v212_v10 = vmul.f32 %v167_v19, %v116_v46 }
 0x117   :  { %v438_v6 = vrot.slane %v437_v1, 2  ;;  %v444_v9 = vrot.slane %v443_v48, 2  ;;  %v213_v11 = vmul.f32 %v167_v19, %v117_v54  ;;  %v5920_v12 = vunpack.c.l.b16 %v531_v17  ;;  %v132_v17 = vld [vmem:[#allocation2 + $0x160] sm:$0xff] }
 0x118   :  { %v5922_v14 = vadd.f32 %v414_v62, %v413_v59  ;;  %v5924_v7 = vadd.f32 %v420_v2, %v419_v40  ;;  %v5926_v8 = vadd.f32 %v426_v3, %v425_v0  ;;  %v5928_v16 = vadd.f32 %v432_v4, %v431_v47 }
 0x119   :  { %v5930_v20 = vadd.f32 %v438_v6, %v437_v1  ;;  %v376_v21 = vrot.slane %v208_v57, 4  ;;  %v382_v24 = vrot.slane %v209_v55, 4  ;;  %v388_v29 = vrot.slane %v210_v37, 4 }
 0x11a   :  { %v394_v30 = vrot.slane %v211_v58, 4  ;;  %v400_v33 = vrot.slane %v212_v10, 4  ;;  %v406_v19 = vrot.slane %v213_v11, 4  ;;  %v5932_v36 = vadd.f32 %v444_v9, %v443_v48 }
 0x11b   :  { %v377_v38 = vadd.f32 %v376_v21, %v208_v57  ;;  %v383_v46 = vadd.f32 %v382_v24, %v209_v55  ;;  %v226_v53 = vmul.f32 %v182_v15, %v130_v5  ;;  %v389_v54 = vadd.f32 %v388_v29, %v210_v37 }
 0x11c   :  { %v395_v59 = vadd.f32 %v394_v30, %v211_v58  ;;  %v401_v40 = vadd.f32 %v400_v33, %v212_v10  ;;  %v407_v0 = vadd.f32 %v406_v19, %v213_v11  ;;  %v227_v62 = vmul.f32 %v182_v15, %v131_v28  ;;  %v177_v19 = vpop.permute.xlu0 %176  ;;  %v128_v10 = vld [vmem:[#allocation2 + $0x140] sm:$0xff] }
 0x11d   :  { %v378_v47 = vrot.slane %v377_v38, 2  ;;  %v384_v1 = vrot.slane %v383_v46, 2  ;;  %v228_v2 = vmul.f32 %v182_v15, %v132_v17  ;;  %v390_v3 = vrot.slane %v389_v54, 2  ;;  %v124_v17 = vld [vmem:[#allocation2 + $0x120] sm:$0xff] }
 0x11e   :  { %v396_v4 = vrot.slane %v395_v59, 2  ;;  %v402_v6 = vrot.slane %v401_v40, 2  ;;  %v408_v13 = vrot.slane %v407_v0, 2  ;;  %v229_v57 = vmul.f32 %v182_v15, %v133_v35 }
 0x11f   :  { %v5934_v23 = vadd.f32 %v378_v47, %v377_v38  ;;  %v385_v48 = vadd.f32 %v384_v1, %v383_v46  ;;  %v230_v55 = vmul.f32 %v182_v15, %v134_v49  ;;  %v5936_v9 = vadd.f32 %v390_v3, %v389_v54  ;;  %v125_v49 = vld [vmem:[#allocation2 + $0x128] sm:$0xff]  ;;  %v127_v3 = vld [vmem:[#allocation2 + $0x138] sm:$0xff] }
 0x120   :  { %v5938_v37 = vadd.f32 %v396_v4, %v395_v59  ;;  %v403_v58 = vadd.f32 %v402_v6, %v401_v40  ;;  %v5940_v5 = vadd.f32 %v408_v13, %v407_v0  ;;  %v231_v21 = vmul.f32 %v182_v15, %v135_v32  ;;  %v126_v40 = vld [vmem:[#allocation2 + $0x130] sm:$0xff] }
 0x121   :  { %v484_v24 = vrot.slane %v226_v53, 4  ;;  %v386_v28 = vrot.slane %v385_v48, 1  ;;  %v490_v38 = vrot.slane %v227_v62, 4  ;;  %v496_v46 = vrot.slane %v228_v2, 4 }
 0x122   :  { %v404_v33 = vrot.slane %v403_v58, 1  ;;  %v502_v13 = vrot.slane %v229_v57, 4  ;;  %v508_v32 = vrot.slane %v230_v55, 4  ;;  %v514_v15 = vrot.slane %v231_v21, 4 }
 0x123   :  { %v5946_v35 = vadd.f32 %v484_v24, %v226_v53  ;;  %v491_v0 = vadd.f32 %v490_v38, %v227_v62  ;;  %v5951_v47 = vadd.f32 %v496_v46, %v228_v2  ;;  %v220_v4 = vmul.f32 %v177_v19, %v124_v17 }
 0x124   :  { %v5948_v54 = vadd.f32 %v404_v33, %v403_v58  ;;  %v5953_v1 = vadd.f32 %v502_v13, %v229_v57  ;;  %v509_v6 = vadd.f32 %v508_v32, %v230_v55  ;;  %v5956_v24 = vadd.f32 %v514_v15, %v231_v21  ;;  %v129_v58 = vld [vmem:[#allocation2 + $0x148] sm:$0xff] }
 0x125   :  { %v221_v33 = vmul.f32 %v177_v19, %v125_v49  ;;  %v492_v29 = vrot.slane %v491_v0, 2  ;;  %v222_v2 = vmul.f32 %v177_v19, %v126_v40  ;;  %v223_v46 = vmul.f32 %v177_v19, %v127_v3 }
 0x126   :  { %6193 = vst [vmem:[#allocation20_spill] sm:$0xff] %v5948_v54  ;;  %v510_v38 = vrot.slane %v509_v6, 2  ;;  %v224_v55 = vmul.f32 %v177_v19, %v128_v10  ;;  %v225_v21 = vmul.f32 %v177_v19, %v129_v58  ;;  %v448_v13 = vrot.slane %v220_v4, 4 }
 0x127   :  { %v454_v32 = vrot.slane %v221_v33, 4  ;;  %v460_v15 = vrot.slane %v222_v2, 4  ;;  %v466_v59 = vrot.slane %v223_v46, 4  ;;  %v387_v53 = vadd.f32 %v386_v28, %v385_v48 }
 0x128   :  { %v5963_v49 = vadd.f32 %v510_v38, %v509_v6  ;;  %v449_v40 = vadd.f32 %v448_v13, %v220_v4  ;;  %v472_v11 = vrot.slane %v224_v55, 4  ;;  %v478_v57 = vrot.slane %v225_v21, 4 }
 0x129   :  { %v455_v62 = vadd.f32 %v454_v32, %v221_v33  ;;  %v461_v3 = vadd.f32 %v460_v15, %v222_v2  ;;  %v467_v30 = vadd.f32 %v466_v59, %v223_v46  ;;  %v422_v10 = vrot.slane %v5924_v7, 1 }
 0x12a   :  { %v512_v17 = vrot.slane %v5963_v49, 1  ;;  %v450_v19 = vrot.slane %v449_v40, 2  ;;  %v473_v45 = vadd.f32 %v472_v11, %v224_v55  ;;  %v479_v6 = vadd.f32 %v478_v57, %v225_v21 }
 0x12b   :  { %v456_v58 = vrot.slane %v455_v62, 2  ;;  %v462_v38 = vrot.slane %v461_v3, 2  ;;  %v468_v54 = vrot.slane %v467_v30, 2  ;;  %v423_v48 = vadd.f32 %v422_v10, %v5924_v7 }
 0x12c   :  { %v493_v28 = vadd.f32 %v492_v29, %v491_v0  ;;  %v5968_v4 = vadd.f32 %v450_v19, %v449_v40  ;;  %v474_v13 = vrot.slane %v473_v45, 2  ;;  %v480_v32 = vrot.slane %v479_v6, 2 }
 0x12d   :  { %v457_v33 = vadd.f32 %v456_v58, %v455_v62  ;;  %v5970_v2 = vadd.f32 %v462_v38, %v461_v3  ;;  %v469_v59 = vadd.f32 %v468_v54, %v467_v30  ;;  %v539_v11 = vpack.c.bf16 %v5900_v52, %v5900_v52 }
 0x12e   :  { %v494_v46 = vrot.slane %v493_v28, 1  ;;  %v475_v57 = vadd.f32 %v474_v13, %v473_v45  ;;  %v5974_v55 = vadd.f32 %v480_v32, %v479_v6  ;;  %v545_v7 = vpack.c.bf16 %v387_v53, %v387_v53 }
 0x12f   :  { %v458_v21 = vrot.slane %v457_v33, 1  ;;  %v551_v0 = vpack.c.bf16 %v423_v48, %v423_v48  ;;  %v955_v15 = vunpack.c.l.b16 %v539_v11  ;;  %v998_v62 = vsel %vm984_vm0, %v5912_v39, %v5888_v41 }
 0x130   :  { %v495_v29 = vadd.f32 %v494_v46, %v493_v28  ;;  %v476_v40 = vrot.slane %v475_v57, 1  ;;  %v961_v10 = vunpack.c.l.b16 %v545_v7  ;;  %v999_v30 = vsel %vm986_vm1, %v5864_v26, %v998_v62 }
 0x131   :  { %v459_v3 = vadd.f32 %v458_v21, %v457_v33  ;;  %v967_v52 = vunpack.c.l.b16 %v551_v0  ;;  %v1000_v45 = vsel %vm988_vm2, %v955_v15, %v999_v30  ;;  %v6194_v53 = vrot.slane %v5938_v37, 1 }
 0x132   :  { %v563_v54 = vpack.c.bf16 %v495_v29, %v495_v29  ;;  %v5985_v58 = vadd.f32 %v476_v40, %v475_v57  ;;  %v1001_v38 = vsel %vm990_vm3, %v961_v10, %v1000_v45  ;;  %v434_v41 = vrot.slane %v5928_v16, 1 }
 0x133   :  { %v399_v19 = vadd.f32 %v6194_v53, %v5938_v37  ;;  %v557_v6 = vpack.c.bf16 %v459_v3, %v459_v3  ;;  %v1002_v48 = vsel %vm992_vm4, %v967_v52, %v1001_v38  ;;  %v470_v28 = vrot.slane %v469_v59, 1 }
 0x134   :  { %v979_v39 = vunpack.c.l.b16 %v563_v54  ;;  %v6195_v26 = vrot.slane %v5953_v1, 2  ;;  %v435_v32 = vadd.f32 %v434_v41, %v5928_v16  ;;  %v541_v37 = vpack.c.bf16 %v5904_v34, %v5904_v34 }
 0x135   :  { %v973_v13 = vunpack.c.l.b16 %v557_v6  ;;  %v547_v46 = vpack.c.bf16 %v399_v19, %v399_v19  ;;  %v471_v11 = vadd.f32 %v470_v28, %v469_v59  ;;  %v1012_v21 = vsel %vm984_vm0, %v5916_v22, %v5892_v44 }
 0x136   :  { %v505_v33 = vadd.f32 %v6195_v26, %v5953_v1  ;;  %v6196_v7 = vrot.slane %v5934_v23, 1  ;;  %v553_v1 = vpack.c.bf16 %v435_v32, %v435_v32  ;;  %v957_v15 = vunpack.c.l.b16 %v541_v37 }
 0x137   :  { %v1003_v0 = vsel %vm994_vm5, %v973_v13, %v1002_v48  ;;  %v963_v62 = vunpack.c.l.b16 %v547_v46  ;;  %v559_v34 = vpack.c.bf16 %v471_v11, %v471_v11  ;;  %v1013_v59 = vsel %vm986_vm1, %v5868_v31, %v1012_v21 }
 0x138   :  { %v506_v57 = vrot.slane %v505_v33, 1  ;;  %v381_v29 = vadd.f32 %v6196_v7, %v5934_v23  ;;  %v1004_v16 = vsel %vm996_vm6, %v979_v39, %v1003_v0  ;;  %v969_v10 = vunpack.c.l.b16 %v553_v1 }
 0x139   :  { %v6006_v3 = vpack.c.b16 %v1004_v16, %v1004_v16  ;;  %v1014_v44 = vsel %vm988_vm2, %v957_v15, %v1013_v59  ;;  %v416_v22 = vrot.slane %v5922_v14, 1  ;;  %v975_v30 = vunpack.c.l.b16 %v559_v34 }
 0x13a   :  { %v507_v40 = vadd.f32 %v506_v57, %v505_v33  ;;  %v1015_v54 = vsel %vm990_vm3, %v963_v62, %v1014_v44  ;;  %v452_v52 = vrot.slane %v5968_v4, 1  ;;  %v6197_v31 = vrot.slane %v5946_v35, 2 }
 0x13b   :  { %2517 = vmatprep.mubr.bf16.mxu1 %v6006_v3  ;;  %v1016_v45 = vsel %vm992_vm4, %v969_v10, %v1015_v54  ;;  %v417_v53 = vadd.f32 %v416_v22, %v5922_v14  ;;  %v538_v6 = vpack.c.bf16 %v5898_v51, %v5898_v51  ;;  %v544_v48 = vpack.c.bf16 %v381_v29, %v381_v29  ;;  %v4949_v22 = vld [vmem:[#allocation5 + $0x8] ss:$24 sps:$4 sm:$0xff]  }
 0x13c   :  { %v565_v23 = vpack.c.bf16 %v507_v40, %v507_v40  ;;  %v487_v19 = vadd.f32 %v6197_v31, %v5946_v35  ;;  %v1017_v41 = vsel %vm994_vm5, %v975_v30, %v1016_v45  ;;  %v453_v39 = vadd.f32 %v452_v52, %v5968_v4 }
 0x13d   :  { %v550_v26 = vpack.c.bf16 %v417_v53, %v417_v53  ;;  %v954_v33 = vunpack.c.l.b16 %v538_v6  ;;  %v985_v14 = vsel %vm984_vm0, %v5910_v18, %v5886_v56  ;;  %v960_v35 = vunpack.c.l.b16 %v544_v48 }
 0x13e   :  { %v981_v38 = vunpack.c.l.b16 %v565_v23  ;;  %v488_v28 = vrot.slane %v487_v19, 1  ;;  %v556_v32 = vpack.c.bf16 %v453_v39, %v453_v39  ;;  %v987_v51 = vsel %vm986_vm1, %v5862_v25, %v985_v14  ;;  %v4963_v14 = vld [vmem:[#allocation5 + $0x6c] ss:$24 sps:$4 sm:$0xff]  }
 0x13f   :  { %v966_v11 = vunpack.c.l.b16 %v550_v26  ;;  %v989_v4 = vsel %vm988_vm2, %v954_v33, %v987_v51  ;;  %v6198_v7 = vrot.slane %v5936_v9, 1  ;;  %v428_v18 = vrot.slane %v5926_v8, 1  ;;  %v4955_v33 = vld [vmem:[#allocation5 + $0x38] ss:$24 sps:$4 sm:$0xff]  }
 0x140   :  { %v1018_v13 = vsel %vm996_vm6, %v981_v38, %v1017_v41  ;;  %v489_v46 = vadd.f32 %v488_v28, %v487_v19  ;;  %v972_v57 = vunpack.c.l.b16 %v556_v32  ;;  %v991_v21 = vsel %vm990_vm3, %v960_v35, %v989_v4 }
 0x141   :  { %v6028_v37 = vpack.c.b16 %v1018_v13, %v1018_v13  ;;  %v393_v56 = vadd.f32 %v6198_v7, %v5936_v9  ;;  %v993_v25 = vsel %vm992_vm4, %v966_v11, %v991_v21  ;;  %v464_v0 = vrot.slane %v5970_v2, 1  ;;  %v4946_v13 = vld [vmem:[#allocation5 + $0x600] ss:$24 sps:$4 sm:$0xff]  }
 0x142   :  { %v562_v29 = vpack.c.bf16 %v489_v46, %v489_v46  ;;  %v6199_v1 = vrot.slane %v5951_v47, 2  ;;  %v995_v62 = vsel %vm994_vm5, %v972_v57, %v993_v25  ;;  %v429_v16 = vadd.f32 %v428_v18, %v5926_v8  ;;  %v4957_v8 = vld [vmem:[#allocation5 + $0x3c] ss:$24 sps:$4 sm:$0xff]  }
 0x143   :  { %2558 = vmatprep.mubr.bf16.mxu0 %v6028_v37  ;;  %v540_v9 = vpack.c.bf16 %v5902_v61, %v5902_v61  ;;  %v546_v40 = vpack.c.bf16 %v393_v56, %v393_v56  ;;  %v465_v59 = vadd.f32 %v464_v0, %v5970_v2  ;;  %v1005_v44 = vsel %vm984_vm0, %v5914_v63, %v5890_v42  ;;  %v4954_v56 = vld [vmem:[#allocation5 + $0x634] ss:$24 sps:$4 sm:$0xff]  }
 0x144   :  { %v499_v15 = vadd.f32 %v6199_v1, %v5951_v47  ;;  %v978_v34 = vunpack.c.l.b16 %v562_v29  ;;  %v552_v23 = vpack.c.bf16 %v429_v16, %v429_v16  ;;  %v1006_v54 = vsel %vm986_vm1, %v5866_v27, %v1005_v44  ;;  %v4952_v44 = vld [vmem:[#allocation5 + $0x630] ss:$24 sps:$4 sm:$0xff]  }
 0x145   :  { %v956_v30 = vunpack.c.l.b16 %v540_v9  ;;  %v962_v47 = vunpack.c.l.b16 %v546_v40  ;;  %v558_v45 = vpack.c.bf16 %v465_v59, %v465_v59  ;;  %v6200_v2 = vrot.slane %v5940_v5, 1  ;;  %v4969_v59 = vld [vmem:[#allocation5 + $0x9c] ss:$24 sps:$4 sm:$0xff]  }
 0x146   :  { %v500_v10 = vrot.slane %v499_v15, 1  ;;  %v997_v52 = vsel %vm996_vm6, %v978_v34, %v995_v62  ;;  %v968_v19 = vunpack.c.l.b16 %v552_v23  ;;  %v446_v63 = vrot.slane %v5932_v36, 1  ;;  %v6203_v62 = vld [vmem:[#allocation20_spill] sm:$0xff] }
 0x147   :  { %v411_v53 = vadd.f32 %v6200_v2, %v5940_v5  ;;  %v6056_v31 = vpack.c.b16 %v997_v52, %v997_v52  ;;  %v1007_v42 = vsel %vm988_vm2, %v956_v30, %v1006_v54  ;;  %v974_v38 = vunpack.c.l.b16 %v558_v45  ;;  %v6205_v30 = vld [vmem:[#allocation17_spill] sm:$0xff]  ;;  %v4975_v52 = vld [vmem:[#allocation5 + $0xcc] ss:$24 sps:$4 sm:$0xff]  }
 0x148   :  { %v501_v61 = vadd.f32 %v500_v10, %v499_v15  ;;  %v1008_v27 = vsel %vm990_vm3, %v962_v47, %v1007_v42  ;;  %v482_v41 = vrot.slane %v5974_v55, 1  ;;  %v447_v48 = vadd.f32 %v446_v63, %v5932_v36  ;;  %v6206_v47 = vld [vmem:[#allocation19_spill] sm:$0xff]  ;;  %v6207_v45 = vld [vmem:[#allocation16_spill] sm:$0xff] }
 0x149   :  { %2518 = vmatmul.mubr.bf16.vlgmr.msra.gmra.mrb[0].mxu1 %v6056_v31  ;;  %v1009_v39 = vsel %vm992_vm4, %v968_v19, %v1008_v27  ;;  %v6201_v5 = vrot.slane %v5956_v24, 2  ;;  %v543_v26 = vpack.c.bf16 %v5906_v60, %v5906_v60  ;;  %v549_v46 = vpack.c.bf16 %v411_v53, %v411_v53  ;;  %v6208_v19 = vld [vmem:[#allocation18_spill] sm:$0xff] }
 0x14a   :  { %v564_v6 = vpack.c.bf16 %v501_v61, %v501_v61  ;;  %v1010_v35 = vsel %vm994_vm5, %v974_v38, %v1009_v39  ;;  %2609 = vmatpush1.bf16.msra.mxu1 %v4949_v22  ;;  %v483_v51 = vadd.f32 %v482_v41, %v5974_v55  ;;  %2640 = vmatprep.mubr.bf16.mxu1 %v6006_v3  ;;  %v4961_v55 = vld [vmem:[#allocation5 + $0x68] ss:$24 sps:$4 sm:$0xff]   ;;  %v4960_v22 = vld [vmem:[#allocation5 + $0x664] ss:$24 sps:$4 sm:$0xff]   ;;  %v4966_v41 = vld [vmem:[#allocation5 + $0x694] ss:$24 sps:$4 sm:$0xff]  }
 0x14b   :  { %v517_v28 = vadd.f32 %v6201_v5, %v5956_v24  ;;  %v555_v11 = vpack.c.bf16 %v447_v48, %v447_v48  ;;  %v959_v4 = vunpack.c.l.b16 %v543_v26  ;;  %v1026_v24 = vsel %vm984_vm0, %v5920_v12, %v5896_v50  ;;  %2610 = vmatprep.subr.bf16.mxu1 %v4957_v8  ;;  %v4958_v27 = vld [vmem:[#allocation5 + $0x660] ss:$24 sps:$4 sm:$0xff]   ;;  %v4981_v5 = vld [vmem:[#allocation5 + $0xfc] ss:$24 sps:$4 sm:$0xff]  }
 0x14c   :  { %v980_v32 = vunpack.c.l.b16 %v564_v6  ;;  %v561_v57 = vpack.c.bf16 %v483_v51, %v483_v51  ;;  %v965_v21 = vunpack.c.l.b16 %v549_v46  ;;  %v1027_v7 = vsel %vm986_vm1, %v5878_v43, %v1026_v24  ;;  %v4973_v39 = vld [vmem:[#allocation5 + $0xc8] ss:$24 sps:$4 sm:$0xff]   ;;  %v4978_v51 = vld [vmem:[#allocation5 + $0x6f4] ss:$24 sps:$4 sm:$0xff]   ;;  %v4991_v24 = vld [vmem:[#allocation5 + $0x158] ss:$24 sps:$4 sm:$0xff]  }
 0x14d   :  { %v518_v36 = vrot.slane %v517_v28, 1  ;;  %v971_v25 = vunpack.c.l.b16 %v555_v11  ;;  %v1028_v0 = vsel %vm988_vm2, %v959_v4, %v1027_v7  ;;  %v6202_v50 = vrot.slane %v5930_v20, 1  ;;  %v4985_v46 = vld [vmem:[#allocation5 + $0x128] ss:$24 sps:$4 sm:$0xff]   ;;  %v4984_v4 = vld [vmem:[#allocation5 + $0x724] ss:$24 sps:$4 sm:$0xff]  }
 0x14e   :  { %v1011_v60 = vsel %vm996_vm6, %v980_v32, %v1010_v35  ;;  %v977_v1 = vunpack.c.l.b16 %v561_v57  ;;  %v1029_v15 = vsel %vm990_vm3, %v965_v21, %v1028_v0  ;;  %2611 = vmatpush1.bf16.msra.mxu1 %v4955_v33  ;;  %v513_v43 = vadd.f32 %v512_v17, %v5963_v49  ;;  %v4967_v17 = vld [vmem:[#allocation5 + $0x98] ss:$24 sps:$4 sm:$0xff]   ;;  %v4987_v32 = vld [vmem:[#allocation5 + $0x12c] ss:$24 sps:$4 sm:$0xff]   ;;  %v4997_v7 = vld [vmem:[#allocation5 + $0x188] ss:$24 sps:$4 sm:$0xff]  }
 0x14f   :  { %v6079_v18 = vpack.c.b16 %v1011_v60, %v1011_v60  ;;  %v519_v29 = vadd.f32 %v518_v36, %v517_v28  ;;  %v441_v12 = vadd.f32 %v6202_v50, %v5930_v20  ;;  %v6204_v16 = vpack.c.bf16 %v6203_v62, %v6203_v62  ;;  %2612 = vmatprep.subr.bf16.mxu1 %v4963_v14  ;;  %v4964_v33 = vld [vmem:[#allocation5 + $0x690] ss:$24 sps:$4 sm:$0xff]   ;;  %v4972_v14 = vld [vmem:[#allocation5 + $0x6c4] ss:$24 sps:$4 sm:$0xff]   ;;  %v4970_v35 = vld [vmem:[#allocation5 + $0x6c0] ss:$24 sps:$4 sm:$0xff]  }
 0x150   :  { %v1030_v34 = vsel %vm992_vm4, %v971_v25, %v1029_v15  ;;  %v560_v10 = vpack.c.bf16 %v5985_v58, %v5985_v58  ;;  %v566_v23 = vpack.c.bf16 %v513_v43, %v513_v43  ;;  %v1019_v54 = vsel %vm984_vm0, %v6206_v47, %v6205_v30  ;;  %v4993_v36 = vld [vmem:[#allocation5 + $0x15c] ss:$24 sps:$4 sm:$0xff]   ;;  %v4976_v11 = vld [vmem:[#allocation5 + $0x6f0] ss:$24 sps:$4 sm:$0xff]   ;;  %v4999_v60 = vld [vmem:[#allocation5 + $0x18c] ss:$24 sps:$4 sm:$0xff]  }
 0x151   :  { %v964_v9 = vunpack.c.l.b16 %v6204_v16  ;;  %2559 = vmatmul.mubr.bf16.vlgmr.msra.gmra.mrb[0].mxu0 %v6079_v18  ;;  %v567_v40 = vpack.c.bf16 %v519_v29, %v519_v29  ;;  %v1031_v20 = vsel %vm994_vm5, %v977_v1, %v1030_v34  ;;  %v554_v49 = vpack.c.bf16 %v441_v12, %v441_v12  ;;  %v4982_v57 = vld [vmem:[#allocation5 + $0x720] ss:$24 sps:$4 sm:$0xff]   ;;  %v4990_v21 = vld [vmem:[#allocation5 + $0x754] ss:$24 sps:$4 sm:$0xff]   ;;  %v4996_v29 = vld [vmem:[#allocation5 + $0x784] ss:$24 sps:$4 sm:$0xff]  }
 0x152   :  { %2568 = vmatpush1.bf16.msra.mxu0 %v4946_v13  ;;  %v976_v61 = vunpack.c.l.b16 %v560_v10  ;;  %v1020_v2 = vsel %vm986_vm1, %v6207_v45, %v1019_v54  ;;  %2613 = vmatpush1.bf16.msra.mxu1 %v4961_v55  ;;  %v982_v53 = vunpack.c.l.b16 %v566_v23  ;;  %v4979_v13 = vld [vmem:[#allocation5 + $0xf8] ss:$24 sps:$4 sm:$0xff]   ;;  %v5011_v0 = vld [vmem:[#allocation5 + $0x1ec] ss:$24 sps:$4 sm:$0xff]   ;;  %v5009_v50 = vld [vmem:[#allocation5 + $0x1e8] ss:$24 sps:$4 sm:$0xff]  }
 0x153   :  { %v983_v8 = vunpack.c.l.b16 %v567_v40  ;;  %2569 = vmatprep.subr.bf16.mxu0 %v4954_v56  ;;  %v970_v58 = vunpack.c.l.b16 %v554_v49  ;;  %v1021_v42 = vsel %vm988_vm2, %v6208_v19, %v1020_v2  ;;  %2614 = vmatprep.subr.bf16.mxu1 %v4969_v59  ;;  %v5005_v56 = vld [vmem:[#allocation5 + $0x1bc] ss:$24 sps:$4 sm:$0xff]   ;;  %v4988_v55 = vld [vmem:[#allocation5 + $0x750] ss:$24 sps:$4 sm:$0xff]   ;;  %v4994_v1 = vld [vmem:[#allocation5 + $0x780] ss:$24 sps:$4 sm:$0xff]  }
 0x154   :  { %v1022_v6 = vsel %vm990_vm3, %v964_v9, %v1021_v42  ;;  %v5003_v25 = vld [vmem:[#allocation5 + $0x1b8] ss:$24 sps:$4 sm:$0xff]   ;;  %v5002_v15 = vld [vmem:[#allocation5 + $0x7b4] ss:$24 sps:$4 sm:$0xff]   ;;  %v5008_v62 = vld [vmem:[#allocation5 + $0x7e4] ss:$24 sps:$4 sm:$0xff]  }
 0x155   :  { %v1032_v63 = vsel %vm996_vm6, %v983_v8, %v1031_v20  ;;  %v1023_v48 = vsel %vm992_vm4, %v970_v58, %v1022_v6  ;;  %v5017_v12 = vld [vmem:[#allocation5 + $0x21c] ss:$24 sps:$4 sm:$0xff]   ;;  %v5000_v43 = vld [vmem:[#allocation5 + $0x7b0] ss:$24 sps:$4 sm:$0xff]   ;;  %v5023_v9 = vld [vmem:[#allocation5 + $0x24c] ss:$24 sps:$4 sm:$0xff]  }
 0x156   :  { %v6106_v38 = vpack.c.b16 %v1032_v63, %v1032_v63  ;;  %2570 = vmatpush1.bf16.msra.mxu0 %v4952_v44  ;;  %v1024_v28 = vsel %vm994_vm5, %v976_v61, %v1023_v48  ;;  %2615 = vmatpush1.bf16.msra.mxu1 %v4967_v17  ;;  %v5015_v16 = vld [vmem:[#allocation5 + $0x218] ss:$24 sps:$4 sm:$0xff]   ;;  %v5014_v34 = vld [vmem:[#allocation5 + $0x814] ss:$24 sps:$4 sm:$0xff]   ;;  %v5021_v59 = vld [vmem:[#allocation5 + $0x248] ss:$24 sps:$4 sm:$0xff]  }
 0x157   :  { %2571 = vmatprep.subr.bf16.mxu0 %v4960_v22  ;;  %v6112_v26 = vsel %vm996_vm6, %v982_v53, %v1024_v28  ;;  %2616 = vmatprep.subr.bf16.mxu1 %v4975_v52  ;;  %v5006_v40 = vld [vmem:[#allocation5 + $0x7e0] ss:$24 sps:$4 sm:$0xff]   ;;  %v5029_v10 = vld [vmem:[#allocation5 + $0x27c] ss:$24 sps:$4 sm:$0xff]   ;;  %v5012_v20 = vld [vmem:[#allocation5 + $0x810] ss:$24 sps:$4 sm:$0xff]  }
 0x158   :  { %2599 = vmatprep.mubr.bf16.mxu0 %v6106_v38  ;;  %v5020_v44 = vld [vmem:[#allocation5 + $0x844] ss:$24 sps:$4 sm:$0xff]   ;;  %v5027_v22 = vld [vmem:[#allocation5 + $0x278] ss:$24 sps:$4 sm:$0xff]   ;;  %v5026_v23 = vld [vmem:[#allocation5 + $0x874] ss:$24 sps:$4 sm:$0xff]  }
 0x159   :  { %v5035_v17 = vld [vmem:[#allocation5 + $0x2ac] ss:$24 sps:$4 sm:$0xff]   ;;  %v5018_v49 = vld [vmem:[#allocation5 + $0x840] ss:$24 sps:$4 sm:$0xff]   ;;  %v5041_v47 = vld [vmem:[#allocation5 + $0x2dc] ss:$24 sps:$4 sm:$0xff]  }
 0x15a   :  { %2572 = vmatpush1.bf16.msra.mxu0 %v4958_v27  ;;  %2617 = vmatpush1.bf16.msra.mxu1 %v4973_v39  ;;  %v5033_v30 = vld [vmem:[#allocation5 + $0x2a8] ss:$24 sps:$4 sm:$0xff]   ;;  %v5032_v8 = vld [vmem:[#allocation5 + $0x8a4] ss:$24 sps:$4 sm:$0xff]   ;;  %v5039_v52 = vld [vmem:[#allocation5 + $0x2d8] ss:$24 sps:$4 sm:$0xff]  }
 0x15b   :  { %2573 = vmatprep.subr.bf16.mxu0 %v4966_v41  ;;  %2618 = vmatprep.subr.bf16.mxu1 %v4981_v5  ;;  %v5024_v54 = vld [vmem:[#allocation5 + $0x870] ss:$24 sps:$4 sm:$0xff]   ;;  %v5044_v61 = vld [vmem:[#allocation5 + $0x30c] ss:$24 sps:$4 sm:$0xff]   ;;  %v5030_v45 = vld [vmem:[#allocation5 + $0x8a0] ss:$24 sps:$4 sm:$0xff]   ;;  %v6118_v41 = vpack.c.b16 %v6112_v26, %v6112_v26 }
 0x15c   :  { %v5038_v2 = vld [vmem:[#allocation5 + $0x8d4] ss:$24 sps:$4 sm:$0xff]   ;;  %v5042_v58 = vld [vmem:[#allocation5 + $0x308] ss:$24 sps:$4 sm:$0xff]   ;;  %v5048_v63 = vld [vmem:[#allocation5 + $0x338] ss:$24 sps:$4 sm:$0xff]  }
 0x15d   :  { %v5050_v53 = vld [vmem:[#allocation5 + $0x33c] ss:$24 sps:$4 sm:$0xff]   ;;  %v5036_v19 = vld [vmem:[#allocation5 + $0x8d0] ss:$24 sps:$4 sm:$0xff]   ;;  %v5056_v6 = vld [vmem:[#allocation5 + $0x36c] ss:$24 sps:$4 sm:$0xff]  }
 0x15e   :  { %2574 = vmatpush1.bf16.msra.mxu0 %v4964_v33  ;;  %2619 = vmatpush1.bf16.msra.mxu1 %v4979_v13  ;;  %v5047_v42 = vld [vmem:[#allocation5 + $0x14] ss:$24 sps:$4 sm:$0xff]   ;;  %v5045_v27 = vld [vmem:[#allocation5 + $0x10] ss:$24 sps:$4 sm:$0xff]   ;;  %v5053_v39 = vld [vmem:[#allocation5 + $0x44] ss:$24 sps:$4 sm:$0xff]  }
 0x15f   :  { %2575 = vmatprep.subr.bf16.mxu0 %v4972_v14  ;;  %2620 = vmatprep.subr.bf16.mxu1 %v4987_v32  ;;  %v5054_v48 = vld [vmem:[#allocation5 + $0x368] ss:$24 sps:$4 sm:$0xff]   ;;  %v5062_v5 = vld [vmem:[#allocation5 + $0x39c] ss:$24 sps:$4 sm:$0xff]   ;;  %v5060_v14 = vld [vmem:[#allocation5 + $0x398] ss:$24 sps:$4 sm:$0xff]  }
 0x160   :  { %v5051_v28 = vld [vmem:[#allocation5 + $0x40] ss:$24 sps:$4 sm:$0xff]   ;;  %v5059_v33 = vld [vmem:[#allocation5 + $0x74] ss:$24 sps:$4 sm:$0xff]   ;;  %v5057_v26 = vld [vmem:[#allocation5 + $0x70] ss:$24 sps:$4 sm:$0xff]  }
 0x161   :  { %v5068_v13 = vld [vmem:[#allocation5 + $0x3cc] ss:$24 sps:$4 sm:$0xff]  }
 0x162   :  { %2576 = vmatpush1.bf16.msra.mxu0 %v4970_v35  ;;  %2621 = vmatpush1.bf16.msra.mxu1 %v4985_v46  ;;  %v5065_v32 = vld [vmem:[#allocation5 + $0xa4] ss:$24 sps:$4 sm:$0xff]   ;;  %v5066_v35 = vld [vmem:[#allocation5 + $0x3c8] ss:$24 sps:$4 sm:$0xff]  }
 0x163   :  { %2577 = vmatprep.subr.bf16.mxu0 %v4978_v51  ;;  %2622 = vmatprep.subr.bf16.mxu1 %v4993_v36  ;;  %v5074_v51 = vld [vmem:[#allocation5 + $0x3fc] ss:$24 sps:$4 sm:$0xff]   ;;  %v5063_v46 = vld [vmem:[#allocation5 + $0xa0] ss:$24 sps:$4 sm:$0xff]  }
 0x164   :  { %v5071_v36 = vld [vmem:[#allocation5 + $0xd4] ss:$24 sps:$4 sm:$0xff]  }
 0x166   :  { %2578 = vmatpush1.bf16.msra.mxu0 %v4976_v11  ;;  %2623 = vmatpush1.bf16.msra.mxu1 %v4991_v24  ;;  %v5080_v11 = vld [vmem:[#allocation5 + $0x42c] ss:$24 sps:$4 sm:$0xff]  }
 0x167   :  { %2579 = vmatprep.subr.bf16.mxu0 %v4984_v4  ;;  %2624 = vmatprep.subr.bf16.mxu1 %v4999_v60  ;;  %v5069_v4 = vld [vmem:[#allocation5 + $0xd0] ss:$24 sps:$4 sm:$0xff]   ;;  %v5077_v24 = vld [vmem:[#allocation5 + $0x104] ss:$24 sps:$4 sm:$0xff]  }
 0x168   :  { %v5078_v60 = vld [vmem:[#allocation5 + $0x428] ss:$24 sps:$4 sm:$0xff]  }
 0x16a   :  { %2580 = vmatpush1.bf16.msra.mxu0 %v4982_v57  ;;  %2625 = vmatpush1.bf16.msra.mxu1 %v4997_v7  ;;  %v5086_v57 = vld [vmem:[#allocation5 + $0x45c] ss:$24 sps:$4 sm:$0xff]  }
 0x16b   :  { %2581 = vmatprep.subr.bf16.mxu0 %v4990_v21  ;;  %2626 = vmatprep.subr.bf16.mxu1 %v5005_v56  ;;  %v5075_v21 = vld [vmem:[#allocation5 + $0x100] ss:$24 sps:$4 sm:$0xff]   ;;  %v5083_v7 = vld [vmem:[#allocation5 + $0x134] ss:$24 sps:$4 sm:$0xff]  }
 0x16c   :  { %v5084_v56 = vld [vmem:[#allocation5 + $0x458] ss:$24 sps:$4 sm:$0xff]  }
 0x16e   :  { %2582 = vmatpush1.bf16.msra.mxu0 %v4988_v55  ;;  %2627 = vmatpush1.bf16.msra.mxu1 %v5003_v25  ;;  %v5092_v55 = vld [vmem:[#allocation5 + $0x48c] ss:$24 sps:$4 sm:$0xff]  }
 0x16f   :  { %2583 = vmatprep.subr.bf16.mxu0 %v4996_v29  ;;  %2628 = vmatprep.subr.bf16.mxu1 %v5011_v0  ;;  %v5081_v29 = vld [vmem:[#allocation5 + $0x130] ss:$24 sps:$4 sm:$0xff]   ;;  %v5089_v25 = vld [vmem:[#allocation5 + $0x164] ss:$24 sps:$4 sm:$0xff]  }
 0x170   :  { %v5090_v0 = vld [vmem:[#allocation5 + $0x488] ss:$24 sps:$4 sm:$0xff]  }
 0x172   :  { %2584 = vmatpush1.bf16.msra.mxu0 %v4994_v1  ;;  %2629 = vmatpush1.bf16.msra.mxu1 %v5009_v50  ;;  %v5098_v1 = vld [vmem:[#allocation5 + $0x4bc] ss:$24 sps:$4 sm:$0xff]  }
 0x173   :  { %2585 = vmatprep.subr.bf16.mxu0 %v5002_v15  ;;  %2630 = vmatprep.subr.bf16.mxu1 %v5017_v12  ;;  %v5087_v15 = vld [vmem:[#allocation5 + $0x160] ss:$24 sps:$4 sm:$0xff]   ;;  %v5095_v50 = vld [vmem:[#allocation5 + $0x194] ss:$24 sps:$4 sm:$0xff]  }
 0x174   :  { %v5096_v12 = vld [vmem:[#allocation5 + $0x4b8] ss:$24 sps:$4 sm:$0xff]  }
 0x176   :  { %2586 = vmatpush1.bf16.msra.mxu0 %v5000_v43  ;;  %2631 = vmatpush1.bf16.msra.mxu1 %v5015_v16  ;;  %v5104_v43 = vld [vmem:[#allocation5 + $0x4ec] ss:$24 sps:$4 sm:$0xff]  }
 0x177   :  { %2587 = vmatprep.subr.bf16.mxu0 %v5008_v62  ;;  %2632 = vmatprep.subr.bf16.mxu1 %v5023_v9  ;;  %v5093_v62 = vld [vmem:[#allocation5 + $0x190] ss:$24 sps:$4 sm:$0xff]   ;;  %v5101_v16 = vld [vmem:[#allocation5 + $0x1c4] ss:$24 sps:$4 sm:$0xff]  }
 0x178   :  { %v5102_v9 = vld [vmem:[#allocation5 + $0x4e8] ss:$24 sps:$4 sm:$0xff]  }
 0x17a   :  { %2588 = vmatpush1.bf16.msra.mxu0 %v5006_v40  ;;  %2633 = vmatpush1.bf16.msra.mxu1 %v5021_v59  ;;  %v5110_v40 = vld [vmem:[#allocation5 + $0x51c] ss:$24 sps:$4 sm:$0xff]  }
 0x17b   :  { %2589 = vmatprep.subr.bf16.mxu0 %v5014_v34  ;;  %2634 = vmatprep.subr.bf16.mxu1 %v5029_v10  ;;  %v5099_v34 = vld [vmem:[#allocation5 + $0x1c0] ss:$24 sps:$4 sm:$0xff]   ;;  %v5107_v59 = vld [vmem:[#allocation5 + $0x1f4] ss:$24 sps:$4 sm:$0xff]  }
 0x17c   :  { %v5108_v10 = vld [vmem:[#allocation5 + $0x518] ss:$24 sps:$4 sm:$0xff]  }
 0x17e   :  { %2590 = vmatpush1.bf16.msra.mxu0 %v5012_v20  ;;  %2635 = vmatpush1.bf16.msra.mxu1 %v5027_v22  ;;  %v5116_v20 = vld [vmem:[#allocation5 + $0x54c] ss:$24 sps:$4 sm:$0xff]  }
 0x17f   :  { %2591 = vmatprep.subr.bf16.mxu0 %v5020_v44  ;;  %2636 = vmatprep.subr.bf16.mxu1 %v5035_v17  ;;  %v5105_v44 = vld [vmem:[#allocation5 + $0x1f0] ss:$24 sps:$4 sm:$0xff]   ;;  %v5113_v22 = vld [vmem:[#allocation5 + $0x224] ss:$24 sps:$4 sm:$0xff]  }
 0x180   :  { %v5114_v17 = vld [vmem:[#allocation5 + $0x548] ss:$24 sps:$4 sm:$0xff]  }
 0x182   :  { %2592 = vmatpush1.bf16.msra.mxu0 %v5018_v49  ;;  %2637 = vmatpush1.bf16.msra.mxu1 %v5033_v30  ;;  %v5122_v49 = vld [vmem:[#allocation5 + $0x57c] ss:$24 sps:$4 sm:$0xff]  }
 0x183   :  { %2593 = vmatprep.subr.bf16.mxu0 %v5026_v23  ;;  %2638 = vmatprep.subr.bf16.mxu1 %v5041_v47  ;;  %v5111_v23 = vld [vmem:[#allocation5 + $0x220] ss:$24 sps:$4 sm:$0xff]   ;;  %v5119_v30 = vld [vmem:[#allocation5 + $0x254] ss:$24 sps:$4 sm:$0xff]  }
 0x184   :  { %v5120_v47 = vld [vmem:[#allocation5 + $0x578] ss:$24 sps:$4 sm:$0xff]  }
 0x186   :  { %2594 = vmatpush1.bf16.msra.mxu0 %v5024_v54  ;;  %2639 = vmatpush1.bf16.msra.mxu1 %v5039_v52  ;;  %v5128_v54 = vld [vmem:[#allocation5 + $0x5ac] ss:$24 sps:$4 sm:$0xff]  }
 0x187   :  { %2595 = vmatprep.subr.bf16.mxu0 %v5032_v8  ;;  %2649 = vmatprep.subr.bf16.mxu1 %v5044_v61  ;;  %v5117_v8 = vld [vmem:[#allocation5 + $0x250] ss:$24 sps:$4 sm:$0xff]   ;;  %v5125_v52 = vld [vmem:[#allocation5 + $0x284] ss:$24 sps:$4 sm:$0xff]  }
 0x188   :  { %v5126_v61 = vld [vmem:[#allocation5 + $0x5a8] ss:$24 sps:$4 sm:$0xff]  }
 0x189   :  { %2641 = vmatmul.mubr.bf16.vlgmr.msra.gmra.mrb[4].mxu1 %v6056_v31 }
 0x18a   :  { %2596 = vmatpush1.bf16.msra.mxu0 %v5030_v45  ;;  %2650 = vmatpush1.bf16.msra.mxu1 %v5042_v58  ;;  %v5134_v45 = vld [vmem:[#allocation5 + $0x5dc] ss:$24 sps:$4 sm:$0xff]  }
 0x18b   :  { %2597 = vmatprep.subr.bf16.mxu0 %v5038_v2  ;;  %2681 = vmatprep.mubr.bf16.mxu1 %v6028_v37  ;;  %v5123_v2 = vld [vmem:[#allocation5 + $0x280] ss:$24 sps:$4 sm:$0xff]   ;;  %v5131_v58 = vld [vmem:[#allocation5 + $0x2b4] ss:$24 sps:$4 sm:$0xff]  }
 0x18c   :  { %2651 = vmatprep.subr.bf16.mxu1 %v5050_v53  ;;  %v5132_v53 = vld [vmem:[#allocation5 + $0x5d8] ss:$24 sps:$4 sm:$0xff]  }
 0x18e   :  { %2598 = vmatpush1.bf16.msra.mxu0 %v5036_v19  ;;  %2652 = vmatpush1.bf16.msra.mxu1 %v5048_v63  ;;  %v5140_v19 = vld [vmem:[#allocation5 + $0x60c] ss:$24 sps:$4 sm:$0xff]  }
 0x18f   :  { %2731 = vmatprep.subr.bf16.mxu0 %v5047_v42  ;;  %2653 = vmatprep.subr.bf16.mxu1 %v5056_v6  ;;  %v5129_v42 = vld [vmem:[#allocation5 + $0x2b0] ss:$24 sps:$4 sm:$0xff]   ;;  %v5137_v63 = vld [vmem:[#allocation5 + $0x2e4] ss:$24 sps:$4 sm:$0xff]  }
 0x190   :  { %v5138_v6 = vld [vmem:[#allocation5 + $0x608] ss:$24 sps:$4 sm:$0xff]  }
 0x191   :  { %2600 = vmatmul.mubr.bf16.vlgmr.msra.gmra.mrb[0].mxu0 %v6118_v41 }
 0x192   :  { %2732 = vmatpush1.bf16.msra.mxu0 %v5045_v27  ;;  %2763 = vmatprep.mubr.bf16.mxu0 %v6006_v3  ;;  %v5072_v3 = vld [vmem:[#allocation5 + $0x3f8] ss:$24 sps:$4 sm:$0xff]   ;;  %v5146_v27 = vld [vmem:[#allocation5 + $0x63c] ss:$24 sps:$4 sm:$0xff]  }
 0x193   :  { %2733 = vmatprep.subr.bf16.mxu0 %v5053_v39  ;;  %2654 = vmatpush1.bf16.msra.mxu1 %v5054_v48  ;;  %v5135_v39 = vld [vmem:[#allocation5 + $0x2e0] ss:$24 sps:$4 sm:$0xff]   ;;  %v5143_v48 = vld [vmem:[#allocation5 + $0x314] ss:$24 sps:$4 sm:$0xff]  }
 0x194   :  { %2655 = vmatprep.subr.bf16.mxu1 %v5062_v5  ;;  %v5144_v5 = vld [vmem:[#allocation5 + $0x638] ss:$24 sps:$4 sm:$0xff]  }
 0x196   :  { %2734 = vmatpush1.bf16.msra.mxu0 %v5051_v28  ;;  %v5152_v28 = vld [vmem:[#allocation5 + $0x66c] ss:$24 sps:$4 sm:$0xff]  }
 0x197   :  { %2735 = vmatprep.subr.bf16.mxu0 %v5059_v33  ;;  %2656 = vmatpush1.bf16.msra.mxu1 %v5060_v14  ;;  %v5141_v33 = vld [vmem:[#allocation5 + $0x310] ss:$24 sps:$4 sm:$0xff]   ;;  %v5149_v14 = vld [vmem:[#allocation5 + $0x344] ss:$24 sps:$4 sm:$0xff]  }
 0x198   :  { %2657 = vmatprep.subr.bf16.mxu1 %v5068_v13  ;;  %v5150_v13 = vld [vmem:[#allocation5 + $0x668] ss:$24 sps:$4 sm:$0xff]  }
 0x19a   :  { %2736 = vmatpush1.bf16.msra.mxu0 %v5057_v26  ;;  %v5158_v26 = vld [vmem:[#allocation5 + $0x69c] ss:$24 sps:$4 sm:$0xff]  }
 0x19b   :  { %2737 = vmatprep.subr.bf16.mxu0 %v5065_v32  ;;  %2658 = vmatpush1.bf16.msra.mxu1 %v5066_v35  ;;  %v5147_v32 = vld [vmem:[#allocation5 + $0x340] ss:$24 sps:$4 sm:$0xff]   ;;  %v5155_v35 = vld [vmem:[#allocation5 + $0x374] ss:$24 sps:$4 sm:$0xff]  }
 0x19c   :  { %2659 = vmatprep.subr.bf16.mxu1 %v5074_v51  ;;  %v5156_v51 = vld [vmem:[#allocation5 + $0x698] ss:$24 sps:$4 sm:$0xff]  }
 0x19e   :  { %2738 = vmatpush1.bf16.msra.mxu0 %v5063_v46  ;;  %v5164_v46 = vld [vmem:[#allocation5 + $0x6cc] ss:$24 sps:$4 sm:$0xff]  }
 0x19f   :  { %2739 = vmatprep.subr.bf16.mxu0 %v5071_v36  ;;  %2660 = vmatpush1.bf16.msra.mxu1 %v5072_v3  ;;  %v5153_v36 = vld [vmem:[#allocation5 + $0x370] ss:$24 sps:$4 sm:$0xff]   ;;  %v5161_v3 = vld [vmem:[#allocation5 + $0x3a4] ss:$24 sps:$4 sm:$0xff]  }
 0x1a0   :  { %2661 = vmatprep.subr.bf16.mxu1 %v5080_v11  ;;  %v5162_v11 = vld [vmem:[#allocation5 + $0x6c8] ss:$24 sps:$4 sm:$0xff]  }
 0x1a2   :  { %2740 = vmatpush1.bf16.msra.mxu0 %v5069_v4  ;;  %v5159_v4 = vld [vmem:[#allocation5 + $0x3a0] ss:$24 sps:$4 sm:$0xff]  }
 0x1a3   :  { %2741 = vmatprep.subr.bf16.mxu0 %v5077_v24  ;;  %2662 = vmatpush1.bf16.msra.mxu1 %v5078_v60  ;;  %v5167_v24 = vld [vmem:[#allocation5 + $0x3d4] ss:$24 sps:$4 sm:$0xff]  }
 0x1a4   :  { %2663 = vmatprep.subr.bf16.mxu1 %v5086_v57  ;;  %v5176_v60 = vld [vmem:[#allocation5 + $0x72c] ss:$24 sps:$4 sm:$0xff]   ;;  %v5165_v57 = vld [vmem:[#allocation5 + $0x3d0] ss:$24 sps:$4 sm:$0xff]  }
 0x1a6   :  { %2742 = vmatpush1.bf16.msra.mxu0 %v5075_v21  ;;  %v5173_v21 = vld [vmem:[#allocation5 + $0x404] ss:$24 sps:$4 sm:$0xff]  }
 0x1a7   :  { %2743 = vmatprep.subr.bf16.mxu0 %v5083_v7  ;;  %2664 = vmatpush1.bf16.msra.mxu1 %v5084_v56  ;;  %v5174_v7 = vld [vmem:[#allocation5 + $0x728] ss:$24 sps:$4 sm:$0xff]   ;;  %v5182_v56 = vld [vmem:[#allocation5 + $0x75c] ss:$24 sps:$4 sm:$0xff]  }
 0x1a8   :  { %2665 = vmatprep.subr.bf16.mxu1 %v5092_v55  ;;  %v5171_v55 = vld [vmem:[#allocation5 + $0x400] ss:$24 sps:$4 sm:$0xff]  }
 0x1aa   :  { %2744 = vmatpush1.bf16.msra.mxu0 %v5081_v29  ;;  %v5179_v29 = vld [vmem:[#allocation5 + $0x434] ss:$24 sps:$4 sm:$0xff]  }
 0x1ab   :  { %2745 = vmatprep.subr.bf16.mxu0 %v5089_v25  ;;  %2666 = vmatpush1.bf16.msra.mxu1 %v5090_v0  ;;  %v5180_v25 = vld [vmem:[#allocation5 + $0x758] ss:$24 sps:$4 sm:$0xff]   ;;  %v5188_v0 = vld [vmem:[#allocation5 + $0x78c] ss:$24 sps:$4 sm:$0xff]  }
 0x1ac   :  { %2667 = vmatprep.subr.bf16.mxu1 %v5098_v1  ;;  %v5177_v1 = vld [vmem:[#allocation5 + $0x430] ss:$24 sps:$4 sm:$0xff]  }
 0x1ae   :  { %2746 = vmatpush1.bf16.msra.mxu0 %v5087_v15  ;;  %v5185_v15 = vld [vmem:[#allocation5 + $0x464] ss:$24 sps:$4 sm:$0xff]  }
 0x1af   :  { %2747 = vmatprep.subr.bf16.mxu0 %v5095_v50  ;;  %2668 = vmatpush1.bf16.msra.mxu1 %v5096_v12  ;;  %v5186_v50 = vld [vmem:[#allocation5 + $0x788] ss:$24 sps:$4 sm:$0xff]   ;;  %v5194_v12 = vld [vmem:[#allocation5 + $0x7bc] ss:$24 sps:$4 sm:$0xff]  }
 0x1b0   :  { %2669 = vmatprep.subr.bf16.mxu1 %v5104_v43  ;;  %v5183_v43 = vld [vmem:[#allocation5 + $0x460] ss:$24 sps:$4 sm:$0xff]  }
 0x1b2   :  { %2748 = vmatpush1.bf16.msra.mxu0 %v5093_v62  ;;  %v5191_v62 = vld [vmem:[#allocation5 + $0x494] ss:$24 sps:$4 sm:$0xff]  }
 0x1b3   :  { %2749 = vmatprep.subr.bf16.mxu0 %v5101_v16  ;;  %2670 = vmatpush1.bf16.msra.mxu1 %v5102_v9  ;;  %v5192_v16 = vld [vmem:[#allocation5 + $0x7b8] ss:$24 sps:$4 sm:$0xff]   ;;  %v5200_v9 = vld [vmem:[#allocation5 + $0x7ec] ss:$24 sps:$4 sm:$0xff]  }
 0x1b4   :  { %2671 = vmatprep.subr.bf16.mxu1 %v5110_v40  ;;  %v5189_v40 = vld [vmem:[#allocation5 + $0x490] ss:$24 sps:$4 sm:$0xff]  }
 0x1b6   :  { %2750 = vmatpush1.bf16.msra.mxu0 %v5099_v34  ;;  %v5197_v34 = vld [vmem:[#allocation5 + $0x4c4] ss:$24 sps:$4 sm:$0xff]  }
 0x1b7   :  { %2751 = vmatprep.subr.bf16.mxu0 %v5107_v59  ;;  %2672 = vmatpush1.bf16.msra.mxu1 %v5108_v10  ;;  %v5198_v59 = vld [vmem:[#allocation5 + $0x7e8] ss:$24 sps:$4 sm:$0xff]   ;;  %v5206_v10 = vld [vmem:[#allocation5 + $0x81c] ss:$24 sps:$4 sm:$0xff]  }
 0x1b8   :  { %2673 = vmatprep.subr.bf16.mxu1 %v5116_v20  ;;  %v5195_v20 = vld [vmem:[#allocation5 + $0x4c0] ss:$24 sps:$4 sm:$0xff]  }
 0x1ba   :  { %2752 = vmatpush1.bf16.msra.mxu0 %v5105_v44  ;;  %v5203_v44 = vld [vmem:[#allocation5 + $0x4f4] ss:$24 sps:$4 sm:$0xff]  }
 0x1bb   :  { %2753 = vmatprep.subr.bf16.mxu0 %v5113_v22  ;;  %2674 = vmatpush1.bf16.msra.mxu1 %v5114_v17  ;;  %v5204_v22 = vld [vmem:[#allocation5 + $0x818] ss:$24 sps:$4 sm:$0xff]   ;;  %v5212_v17 = vld [vmem:[#allocation5 + $0x84c] ss:$24 sps:$4 sm:$0xff]  }
 0x1bc   :  { %2675 = vmatprep.subr.bf16.mxu1 %v5122_v49  ;;  %v5201_v49 = vld [vmem:[#allocation5 + $0x4f0] ss:$24 sps:$4 sm:$0xff]  }
 0x1be   :  { %2754 = vmatpush1.bf16.msra.mxu0 %v5111_v23  ;;  %v5209_v23 = vld [vmem:[#allocation5 + $0x524] ss:$24 sps:$4 sm:$0xff]  }
 0x1bf   :  { %2755 = vmatprep.subr.bf16.mxu0 %v5119_v30  ;;  %2676 = vmatpush1.bf16.msra.mxu1 %v5120_v47  ;;  %v5210_v30 = vld [vmem:[#allocation5 + $0x848] ss:$24 sps:$4 sm:$0xff]   ;;  %v5218_v47 = vld [vmem:[#allocation5 + $0x87c] ss:$24 sps:$4 sm:$0xff]  }
 0x1c0   :  { %2677 = vmatprep.subr.bf16.mxu1 %v5128_v54  ;;  %v5207_v54 = vld [vmem:[#allocation5 + $0x520] ss:$24 sps:$4 sm:$0xff]  }
 0x1c2   :  { %2756 = vmatpush1.bf16.msra.mxu0 %v5117_v8  ;;  %v5215_v8 = vld [vmem:[#allocation5 + $0x554] ss:$24 sps:$4 sm:$0xff]  }
 0x1c3   :  { %2757 = vmatprep.subr.bf16.mxu0 %v5125_v52  ;;  %2678 = vmatpush1.bf16.msra.mxu1 %v5126_v61  ;;  %v5216_v52 = vld [vmem:[#allocation5 + $0x878] ss:$24 sps:$4 sm:$0xff]   ;;  %v5224_v61 = vld [vmem:[#allocation5 + $0x8ac] ss:$24 sps:$4 sm:$0xff]  }
 0x1c4   :  { %2679 = vmatprep.subr.bf16.mxu1 %v5134_v45  ;;  %v5213_v45 = vld [vmem:[#allocation5 + $0x550] ss:$24 sps:$4 sm:$0xff]  }
 0x1c6   :  { %2758 = vmatpush1.bf16.msra.mxu0 %v5123_v2  ;;  %v5221_v2 = vld [vmem:[#allocation5 + $0x584] ss:$24 sps:$4 sm:$0xff]  }
 0x1c7   :  { %2759 = vmatprep.subr.bf16.mxu0 %v5131_v58  ;;  %2680 = vmatpush1.bf16.msra.mxu1 %v5132_v53  ;;  %v5222_v58 = vld [vmem:[#allocation5 + $0x8a8] ss:$24 sps:$4 sm:$0xff]   ;;  %v5230_v53 = vld [vmem:[#allocation5 + $0x8dc] ss:$24 sps:$4 sm:$0xff]  }
 0x1c8   :  { %2690 = vmatprep.subr.bf16.mxu1 %v5140_v19  ;;  %v5219_v19 = vld [vmem:[#allocation5 + $0x580] ss:$24 sps:$4 sm:$0xff]  }
 0x1ca   :  { %2760 = vmatpush1.bf16.msra.mxu0 %v5129_v42  ;;  %2682 = vmatmul.mubr.bf16.vlgmr.msra.gmra.mrb[4].mxu1 %v6079_v18  ;;  %v5227_v42 = vld [vmem:[#allocation5 + $0x5b4] ss:$24 sps:$4 sm:$0xff]  }
 0x1cb   :  { %2761 = vmatprep.subr.bf16.mxu0 %v5137_v63  ;;  %2691 = vmatpush1.bf16.msra.mxu1 %v5138_v6  ;;  %v5228_v63 = vld [vmem:[#allocation5 + $0x8d8] ss:$24 sps:$4 sm:$0xff]  }
 0x1cc   :  { %2722 = vmatprep.mubr.bf16.mxu1 %v6106_v38  ;;  %2692 = vmatprep.subr.bf16.mxu1 %v5146_v27  ;;  %v5266_v6 = vld [vmem:[#allocation8 + $0x4] ss:$16 sps:$4 sm:$0xff]  }
 0x1cd   :  { %v5225_v27 = vld [vmem:[#allocation5 + $0x5b0] ss:$24 sps:$4 sm:$0xff]  }
 0x1ce   :  { %2762 = vmatpush1.bf16.msra.mxu0 %v5135_v39  ;;  %v5233_v39 = vld [vmem:[#allocation5 + $0x5e4] ss:$24 sps:$4 sm:$0xff]  }
 0x1cf   :  { %2772 = vmatprep.subr.bf16.mxu0 %v5143_v48  ;;  %2693 = vmatpush1.bf16.msra.mxu1 %v5144_v5  ;;  %v5264_v48 = vld [vmem:[#allocation8] ss:$16 sps:$4 sm:$0xff]   ;;  %v5272_v5 = vld [vmem:[#allocation8 + $0x24] ss:$16 sps:$4 sm:$0xff]  }
 0x1d0   :  { %2694 = vmatprep.subr.bf16.mxu1 %v5152_v28  ;;  %v5231_v28 = vld [vmem:[#allocation5 + $0x5e0] ss:$24 sps:$4 sm:$0xff]  }
 0x1d1   :  { %2764 = vmatmul.mubr.bf16.vlgmr.msra.gmra.mrb[4].mxu0 %v6056_v31  ;;  %v5170_v31 = vld [vmem:[#allocation5 + $0x6fc] ss:$24 sps:$4 sm:$0xff]  }
 0x1d2   :  { %2773 = vmatpush1.bf16.msra.mxu0 %v5141_v33  ;;  %2804 = vmatprep.mubr.bf16.mxu0 %v6028_v37  ;;  %v5168_v37 = vld [vmem:[#allocation5 + $0x6f8] ss:$24 sps:$4 sm:$0xff]   ;;  %v5236_v33 = vld [vmem:[#allocation5 + $0x614] ss:$24 sps:$4 sm:$0xff]  }
 0x1d3   :  { %2774 = vmatprep.subr.bf16.mxu0 %v5149_v14  ;;  %2695 = vmatpush1.bf16.msra.mxu1 %v5150_v13  ;;  %v5270_v14 = vld [vmem:[#allocation8 + $0x20] ss:$16 sps:$4 sm:$0xff]   ;;  %v5278_v13 = vld [vmem:[#allocation8 + $0x44] ss:$16 sps:$4 sm:$0xff]  }
 0x1d4   :  { %2696 = vmatprep.subr.bf16.mxu1 %v5158_v26  ;;  %v5234_v26 = vld [vmem:[#allocation5 + $0x610] ss:$24 sps:$4 sm:$0xff]  }
 0x1d6   :  { %2775 = vmatpush1.bf16.msra.mxu0 %v5147_v32  ;;  %v5239_v32 = vld [vmem:[#allocation5 + $0x644] ss:$24 sps:$4 sm:$0xff]  }
 0x1d7   :  { %2776 = vmatprep.subr.bf16.mxu0 %v5155_v35  ;;  %2697 = vmatpush1.bf16.msra.mxu1 %v5156_v51  ;;  %v5276_v35 = vld [vmem:[#allocation8 + $0x40] ss:$16 sps:$4 sm:$0xff]   ;;  %v5284_v51 = vld [vmem:[#allocation8 + $0x64] ss:$16 sps:$4 sm:$0xff]  }
 0x1d8   :  { %2698 = vmatprep.subr.bf16.mxu1 %v5164_v46  ;;  %v5237_v46 = vld [vmem:[#allocation5 + $0x640] ss:$24 sps:$4 sm:$0xff]  }
 0x1da   :  { %2777 = vmatpush1.bf16.msra.mxu0 %v5153_v36  ;;  %v5242_v36 = vld [vmem:[#allocation5 + $0x674] ss:$24 sps:$4 sm:$0xff]  }
 0x1db   :  { %2778 = vmatprep.subr.bf16.mxu0 %v5161_v3  ;;  %2699 = vmatpush1.bf16.msra.mxu1 %v5162_v11  ;;  %v5282_v3 = vld [vmem:[#allocation8 + $0x60] ss:$16 sps:$4 sm:$0xff]   ;;  %v5290_v11 = vld [vmem:[#allocation8 + $0x84] ss:$16 sps:$4 sm:$0xff]  }
 0x1dc   :  { %2700 = vmatprep.subr.bf16.mxu1 %v5170_v31  ;;  %v5240_v31 = vld [vmem:[#allocation5 + $0x670] ss:$24 sps:$4 sm:$0xff]  }
 0x1de   :  { %2779 = vmatpush1.bf16.msra.mxu0 %v5159_v4  ;;  %v5245_v4 = vld [vmem:[#allocation5 + $0x6a4] ss:$24 sps:$4 sm:$0xff]  }
 0x1df   :  { %2780 = vmatprep.subr.bf16.mxu0 %v5167_v24  ;;  %2701 = vmatpush1.bf16.msra.mxu1 %v5168_v37  ;;  %v5288_v24 = vld [vmem:[#allocation8 + $0x80] ss:$16 sps:$4 sm:$0xff]  }
 0x1e0   :  { %2702 = vmatprep.subr.bf16.mxu1 %v5176_v60  ;;  %v5243_v37 = vld [vmem:[#allocation5 + $0x6a0] ss:$24 sps:$4 sm:$0xff]   ;;  %v5248_v60 = vld [vmem:[#allocation5 + $0x6d4] ss:$24 sps:$4 sm:$0xff]  }
 0x1e2   :  { %2781 = vmatpush1.bf16.msra.mxu0 %v5165_v57  ;;  %v5302_v57 = vld [vmem:[#allocation8 + $0xc4] ss:$16 sps:$4 sm:$0xff]  }
 0x1e3   :  { %2782 = vmatprep.subr.bf16.mxu0 %v5173_v21  ;;  %2703 = vmatpush1.bf16.msra.mxu1 %v5174_v7  ;;  %v5246_v21 = vld [vmem:[#allocation5 + $0x6d0] ss:$24 sps:$4 sm:$0xff]  }
 0x1e4   :  { %2704 = vmatprep.subr.bf16.mxu1 %v5182_v56  ;;  %v5251_v56 = vld [vmem:[#allocation5 + $0x704] ss:$24 sps:$4 sm:$0xff]  }
 0x1e6   :  { %2783 = vmatpush1.bf16.msra.mxu0 %v5171_v55 }
 0x1e7   :  { %2784 = vmatprep.subr.bf16.mxu0 %v5179_v29  ;;  %2705 = vmatpush1.bf16.msra.mxu1 %v5180_v25  ;;  %v5300_v25 = vld [vmem:[#allocation8 + $0xc0] ss:$16 sps:$4 sm:$0xff]  }
 0x1e8   :  { %2706 = vmatprep.subr.bf16.mxu1 %v5188_v0 }
 0x1ea   :  { %2785 = vmatpush1.bf16.msra.mxu0 %v5177_v1  ;;  %v5308_v1 = vld [vmem:[#allocation8 + $0xe4] ss:$16 sps:$4 sm:$0xff]  }
 0x1eb   :  { %2786 = vmatprep.subr.bf16.mxu0 %v5185_v15  ;;  %2707 = vmatpush1.bf16.msra.mxu1 %v5186_v50  ;;  %v5249_v15 = vld [vmem:[#allocation5 + $0x700] ss:$24 sps:$4 sm:$0xff]   ;;  %v5254_v50 = vld [vmem:[#allocation5 + $0x734] ss:$24 sps:$4 sm:$0xff]  }
 0x1ec   :  { %2708 = vmatprep.subr.bf16.mxu1 %v5194_v12  ;;  %v5306_v12 = vld [vmem:[#allocation8 + $0xe0] ss:$16 sps:$4 sm:$0xff]  }
 0x1ee   :  { %2787 = vmatpush1.bf16.msra.mxu0 %v5183_v43  ;;  %v5314_v43 = vld [vmem:[#allocation8 + $0x104] ss:$16 sps:$4 sm:$0xff]  }
 0x1ef   :  { %2788 = vmatprep.subr.bf16.mxu0 %v5191_v62  ;;  %2709 = vmatpush1.bf16.msra.mxu1 %v5192_v16  ;;  %v5252_v62 = vld [vmem:[#allocation5 + $0x730] ss:$24 sps:$4 sm:$0xff]   ;;  %v5257_v16 = vld [vmem:[#allocation5 + $0x764] ss:$24 sps:$4 sm:$0xff]  }
 0x1f0   :  { %2710 = vmatprep.subr.bf16.mxu1 %v5200_v9  ;;  %v5312_v9 = vld [vmem:[#allocation8 + $0x100] ss:$16 sps:$4 sm:$0xff]  }
 0x1f2   :  { %2789 = vmatpush1.bf16.msra.mxu0 %v5189_v40  ;;  %v5320_v40 = vld [vmem:[#allocation8 + $0x124] ss:$16 sps:$4 sm:$0xff]  }
 0x1f3   :  { %2790 = vmatprep.subr.bf16.mxu0 %v5197_v34  ;;  %2711 = vmatpush1.bf16.msra.mxu1 %v5198_v59  ;;  %v5255_v34 = vld [vmem:[#allocation5 + $0x760] ss:$24 sps:$4 sm:$0xff]   ;;  %v5260_v59 = vld [vmem:[#allocation5 + $0x794] ss:$24 sps:$4 sm:$0xff]  }
 0x1f4   :  { %2712 = vmatprep.subr.bf16.mxu1 %v5206_v10  ;;  %v5318_v10 = vld [vmem:[#allocation8 + $0x120] ss:$16 sps:$4 sm:$0xff]  }
 0x1f6   :  { %2791 = vmatpush1.bf16.msra.mxu0 %v5195_v20  ;;  %v5326_v20 = vld [vmem:[#allocation8 + $0x144] ss:$16 sps:$4 sm:$0xff]  }
 0x1f7   :  { %2792 = vmatprep.subr.bf16.mxu0 %v5203_v44  ;;  %2713 = vmatpush1.bf16.msra.mxu1 %v5204_v22  ;;  %v5258_v44 = vld [vmem:[#allocation5 + $0x790] ss:$24 sps:$4 sm:$0xff]   ;;  %v5263_v22 = vld [vmem:[#allocation5 + $0x7c4] ss:$24 sps:$4 sm:$0xff]  }
 0x1f8   :  { %2714 = vmatprep.subr.bf16.mxu1 %v5212_v17  ;;  %v5324_v17 = vld [vmem:[#allocation8 + $0x140] ss:$16 sps:$4 sm:$0xff]  }
 0x1fa   :  { %2793 = vmatpush1.bf16.msra.mxu0 %v5201_v49  ;;  %v5332_v49 = vld [vmem:[#allocation8 + $0x164] ss:$16 sps:$4 sm:$0xff]  }
 0x1fb   :  { %2794 = vmatprep.subr.bf16.mxu0 %v5209_v23  ;;  %2715 = vmatpush1.bf16.msra.mxu1 %v5210_v30  ;;  %v5261_v23 = vld [vmem:[#allocation5 + $0x7c0] ss:$24 sps:$4 sm:$0xff]   ;;  %v5269_v30 = vld [vmem:[#allocation5 + $0x7f4] ss:$24 sps:$4 sm:$0xff]  }
 0x1fc   :  { %2716 = vmatprep.subr.bf16.mxu1 %v5218_v47  ;;  %v5330_v47 = vld [vmem:[#allocation8 + $0x160] ss:$16 sps:$4 sm:$0xff]  }
 0x1fe   :  { %2795 = vmatpush1.bf16.msra.mxu0 %v5207_v54  ;;  %v5338_v54 = vld [vmem:[#allocation8 + $0x184] ss:$16 sps:$4 sm:$0xff]  }
 0x1ff   :  { %2796 = vmatprep.subr.bf16.mxu0 %v5215_v8  ;;  %2717 = vmatpush1.bf16.msra.mxu1 %v5216_v52  ;;  %v5267_v8 = vld [vmem:[#allocation5 + $0x7f0] ss:$24 sps:$4 sm:$0xff]   ;;  %v5275_v52 = vld [vmem:[#allocation5 + $0x824] ss:$24 sps:$4 sm:$0xff]  }
 0x200   :  { %2718 = vmatprep.subr.bf16.mxu1 %v5224_v61  ;;  %v5336_v61 = vld [vmem:[#allocation8 + $0x180] ss:$16 sps:$4 sm:$0xff]  }
 0x202   :  { %2797 = vmatpush1.bf16.msra.mxu0 %v5213_v45  ;;  %v5344_v45 = vld [vmem:[#allocation8 + $0x1a4] ss:$16 sps:$4 sm:$0xff]  }
 0x203   :  { %2798 = vmatprep.subr.bf16.mxu0 %v5221_v2  ;;  %2719 = vmatpush1.bf16.msra.mxu1 %v5222_v58  ;;  %v5273_v2 = vld [vmem:[#allocation5 + $0x820] ss:$24 sps:$4 sm:$0xff]   ;;  %v5281_v58 = vld [vmem:[#allocation5 + $0x854] ss:$24 sps:$4 sm:$0xff]  }
 0x204   :  { %2720 = vmatprep.subr.bf16.mxu1 %v5230_v53  ;;  %v5342_v53 = vld [vmem:[#allocation8 + $0x1a0] ss:$16 sps:$4 sm:$0xff]  }
 0x206   :  { %2799 = vmatpush1.bf16.msra.mxu0 %v5219_v19  ;;  %v5350_v19 = vld [vmem:[#allocation8 + $0x1c4] ss:$16 sps:$4 sm:$0xff]  }
 0x207   :  { %2800 = vmatprep.subr.bf16.mxu0 %v5227_v42  ;;  %2721 = vmatpush1.bf16.msra.mxu1 %v5228_v63  ;;  %v5279_v42 = vld [vmem:[#allocation5 + $0x850] ss:$24 sps:$4 sm:$0xff]   ;;  %v5287_v63 = vld [vmem:[#allocation5 + $0x884] ss:$24 sps:$4 sm:$0xff]  }
 0x208   :  { %4040 = vmatprep.subr.bf16.mxu1 %v5266_v6  ;;  %v5348_v6 = vld [vmem:[#allocation8 + $0x1c0] ss:$16 sps:$4 sm:$0xff]  }
 0x20a   :  { %2801 = vmatpush1.bf16.msra.mxu0 %v5225_v27  ;;  %2723 = vmatmul.mubr.bf16.vlgmr.msra.gmra.mrb[4].mxu1 %v6118_v41  ;;  %v5356_v27 = vld [vmem:[#allocation8 + $0x1e4] ss:$16 sps:$4 sm:$0xff]  }
 0x20b   :  { %2802 = vmatprep.subr.bf16.mxu0 %v5233_v39  ;;  %4041 = vmatpush1.bf16.msra.mxu1 %v5264_v48  ;;  %v5285_v39 = vld [vmem:[#allocation5 + $0x880] ss:$24 sps:$4 sm:$0xff]   ;;  %v5293_v48 = vld [vmem:[#allocation5 + $0x8b4] ss:$24 sps:$4 sm:$0xff]  }
 0x20c   :  { %4042 = vmatprep.subr.bf16.mxu1 %v5272_v5  ;;  %v5354_v5 = vld [vmem:[#allocation8 + $0x1e0] ss:$16 sps:$4 sm:$0xff]  }
 0x20e   :  { %2803 = vmatpush1.bf16.msra.mxu0 %v5231_v28  ;;  %v5380_v28 = vld [vmem:[#allocation8 + $0x204] ss:$16 sps:$4 sm:$0xff]  }
 0x20f   :  { %2813 = vmatprep.subr.bf16.mxu0 %v5236_v33  ;;  %4043 = vmatpush1.bf16.msra.mxu1 %v5270_v14  ;;  %v5291_v33 = vld [vmem:[#allocation5 + $0x8b0] ss:$24 sps:$4 sm:$0xff]   ;;  %v5299_v14 = vld [vmem:[#allocation5 + $0x8e4] ss:$24 sps:$4 sm:$0xff]  }
 0x210   :  { %4044 = vmatprep.subr.bf16.mxu1 %v5278_v13  ;;  %v5297_v13 = vld [vmem:[#allocation5 + $0x8e0] ss:$24 sps:$4 sm:$0xff]  }
 0x211   :  { %2805 = vmatmul.mubr.bf16.vlgmr.msra.gmra.mrb[4].mxu0 %v6079_v18  ;;  %v5296_v18 = vld [vmem:[#allocation8 + $0xa4] ss:$16 sps:$4 sm:$0xff]  }
 0x212   :  { %2814 = vmatpush1.bf16.msra.mxu0 %v5234_v26  ;;  %2845 = vmatprep.mubr.bf16.mxu0 %v6106_v38  ;;  %v5294_v38 = vld [vmem:[#allocation8 + $0xa0] ss:$16 sps:$4 sm:$0xff]   ;;  %v5305_v26 = vld [vmem:[#allocation8 + $0xc] ss:$16 sps:$4 sm:$0xff]  }
 0x213   :  { %2815 = vmatprep.subr.bf16.mxu0 %v5239_v32  ;;  %4045 = vmatpush1.bf16.msra.mxu1 %v5276_v35  ;;  %v5303_v32 = vld [vmem:[#allocation8 + $0x8] ss:$16 sps:$4 sm:$0xff]   ;;  %v5311_v35 = vld [vmem:[#allocation8 + $0x2c] ss:$16 sps:$4 sm:$0xff]  }
 0x214   :  { %4046 = vmatprep.subr.bf16.mxu1 %v5284_v51  ;;  %v5309_v51 = vld [vmem:[#allocation8 + $0x28] ss:$16 sps:$4 sm:$0xff]  }
 0x216   :  { %2816 = vmatpush1.bf16.msra.mxu0 %v5237_v46  ;;  %v858_v46 = vlaneseq }
 0x217   :  { %2817 = vmatprep.subr.bf16.mxu0 %v5242_v36  ;;  %4047 = vmatpush1.bf16.msra.mxu1 %v5282_v3  ;;  %v5317_v36 = vld [vmem:[#allocation8 + $0x4c] ss:$16 sps:$4 sm:$0xff]   ;;  %v5315_v3 = vld [vmem:[#allocation8 + $0x48] ss:$16 sps:$4 sm:$0xff]  }
 0x218   :  { %4048 = vmatprep.subr.bf16.mxu1 %v5290_v11  ;;  %v6134_v11 = vshrl.u32 %v858_v46, 7  ;;  %v5420_v46 = vld [vmem:[#allocation8 + $0x2e0] ss:$16 sps:$4 sm:$0xff]  }
 0x21a   :  { %2818 = vmatpush1.bf16.msra.mxu0 %v5240_v31  ;;  %v5323_v31 = vld [vmem:[#allocation8 + $0x6c] ss:$16 sps:$4 sm:$0xff]  }
 0x21b   :  { %2819 = vmatprep.subr.bf16.mxu0 %v5245_v4  ;;  %4049 = vmatpush1.bf16.msra.mxu1 %v5288_v24  ;;  %v5321_v4 = vld [vmem:[#allocation8 + $0x68] ss:$16 sps:$4 sm:$0xff]   ;;  %v860_v24 = vsub.s32 0, %v6134_v11 }
 0x21c   :  { %4050 = vmatprep.subr.bf16.mxu1 %v5296_v18  ;;  %v6129_v7 = vpop.f32.mrb[0].mxu1  ;;  %v5329_v18 = vld [vmem:[#allocation8 + $0x8c] ss:$16 sps:$4 sm:$0xff]  }
 0x21d   :  { %v6131_v55 = vpop.f32.mrb[1].mxu1 }
 0x21e   :  { %2820 = vmatpush1.bf16.msra.mxu0 %v5243_v37  ;;  %v2523_v29 = vpop.f32.mrb[2].mxu1  ;;  %v6137_v37 = vld [vmem:[#allocation7] sm:$0x3f] }
 0x21f   :  { %2821 = vmatprep.subr.bf16.mxu0 %v5248_v60  ;;  %4051 = vmatpush1.bf16.msra.mxu1 %v5294_v38  ;;  %v2524_v0 = vpop.f32.mrb[3].mxu1  ;;  %v5327_v60 = vld [vmem:[#allocation8 + $0x88] ss:$16 sps:$4 sm:$0xff]   ;;  %v861_v38 = vrot.slane %v6137_v37, %v860_v24 }
 0x220   :  { %4052 = vmatprep.subr.bf16.mxu1 %v5302_v57  ;;  %v5335_v57 = vld [vmem:[#allocation8 + $0xac] ss:$16 sps:$4 sm:$0xff]  }
 0x221   :  { %v2520_v29 = vadd.f32 %v6129_v7, %v861_v38  ;;  %v5353_v7 = vld [vmem:[#allocation8 + $0x10c] ss:$16 sps:$4 sm:$0xff]  }
 0x222   :  { %2822 = vmatpush1.bf16.msra.mxu0 %v5246_v21  ;;  %v5401_v38 = vld [vmem:[#allocation8 + $0x26c] ss:$16 sps:$4 sm:$0xff]  }
 0x223   :  { %2823 = vmatprep.subr.bf16.mxu0 %v5251_v56  ;;  %4053 = vmatpush1.bf16.msra.mxu1 %v5300_v25  ;;  %v5333_v56 = vld [vmem:[#allocation8 + $0xa8] ss:$16 sps:$4 sm:$0xff]   ;;  %v5341_v25 = vld [vmem:[#allocation8 + $0xcc] ss:$16 sps:$4 sm:$0xff]  }
 0x224   :  { %4054 = vmatprep.subr.bf16.mxu1 %v5308_v1 }
 0x226   :  { %2824 = vmatpush1.bf16.msra.mxu0 %v5249_v15 }
 0x227   :  { %2825 = vmatprep.subr.bf16.mxu0 %v5254_v50  ;;  %4055 = vmatpush1.bf16.msra.mxu1 %v5306_v12 }
 0x228   :  { %4056 = vmatprep.subr.bf16.mxu1 %v5314_v43 }
 0x22a   :  { %2826 = vmatpush1.bf16.msra.mxu0 %v5252_v62  ;;  %v5339_v62 = vld [vmem:[#allocation8 + $0xc8] ss:$16 sps:$4 sm:$0xff]  }
 0x22b   :  { %2827 = vmatprep.subr.bf16.mxu0 %v5257_v16  ;;  %4057 = vmatpush1.bf16.msra.mxu1 %v5312_v9  ;;  %v5347_v9 = vld [vmem:[#allocation8 + $0xec] ss:$16 sps:$4 sm:$0xff]  }
 0x22c   :  { %4058 = vmatprep.subr.bf16.mxu1 %v5320_v40  ;;  %v5345_v40 = vld [vmem:[#allocation8 + $0xe8] ss:$16 sps:$4 sm:$0xff]  }
 0x22e   :  { %2828 = vmatpush1.bf16.msra.mxu0 %v5255_v34  ;;  %v5351_v34 = vld [vmem:[#allocation8 + $0x108] ss:$16 sps:$4 sm:$0xff]  }
 0x22f   :  { %2829 = vmatprep.subr.bf16.mxu0 %v5260_v59  ;;  %4059 = vmatpush1.bf16.msra.mxu1 %v5318_v10 }
 0x230   :  { %4060 = vmatprep.subr.bf16.mxu1 %v5326_v20  ;;  %v5357_v20 = vld [vmem:[#allocation8 + $0x128] ss:$16 sps:$4 sm:$0xff]  }
 0x232   :  { %2830 = vmatpush1.bf16.msra.mxu0 %v5258_v44 }
 0x233   :  { %2831 = vmatprep.subr.bf16.mxu0 %v5263_v22  ;;  %4061 = vmatpush1.bf16.msra.mxu1 %v5324_v17  ;;  %v5362_v22 = vld [vmem:[#allocation8 + $0x14c] ss:$16 sps:$4 sm:$0xff]   ;;  %v5378_v17 = vld [vmem:[#allocation8 + $0x200] ss:$16 sps:$4 sm:$0xff]  }
 0x234   :  { %4062 = vmatprep.subr.bf16.mxu1 %v5332_v49 }
 0x236   :  { %2832 = vmatpush1.bf16.msra.mxu0 %v5261_v23  ;;  %v5386_v23 = vld [vmem:[#allocation8 + $0x224] ss:$16 sps:$4 sm:$0xff]  }
 0x237   :  { %2833 = vmatprep.subr.bf16.mxu0 %v5269_v30  ;;  %4063 = vmatpush1.bf16.msra.mxu1 %v5330_v47  ;;  %v5360_v30 = vld [vmem:[#allocation8 + $0x148] ss:$16 sps:$4 sm:$0xff]   ;;  %v5365_v47 = vld [vmem:[#allocation8 + $0x16c] ss:$16 sps:$4 sm:$0xff]  }
 0x238   :  { %4064 = vmatprep.subr.bf16.mxu1 %v5338_v54  ;;  %v5384_v54 = vld [vmem:[#allocation8 + $0x220] ss:$16 sps:$4 sm:$0xff]  }
 0x23a   :  { %2834 = vmatpush1.bf16.msra.mxu0 %v5267_v8  ;;  %v5392_v8 = vld [vmem:[#allocation8 + $0x244] ss:$16 sps:$4 sm:$0xff]  }
 0x23b   :  { %2835 = vmatprep.subr.bf16.mxu0 %v5275_v52  ;;  %4065 = vmatpush1.bf16.msra.mxu1 %v5336_v61  ;;  %v5363_v52 = vld [vmem:[#allocation8 + $0x168] ss:$16 sps:$4 sm:$0xff]   ;;  %v5368_v61 = vld [vmem:[#allocation8 + $0x18c] ss:$16 sps:$4 sm:$0xff]  }
 0x23c   :  { %4066 = vmatprep.subr.bf16.mxu1 %v5344_v45  ;;  %v5390_v45 = vld [vmem:[#allocation8 + $0x240] ss:$16 sps:$4 sm:$0xff]  }
 0x23e   :  { %2836 = vmatpush1.bf16.msra.mxu0 %v5273_v2  ;;  %v5398_v2 = vld [vmem:[#allocation8 + $0x264] ss:$16 sps:$4 sm:$0xff]  }
 0x23f   :  { %2837 = vmatprep.subr.bf16.mxu0 %v5281_v58  ;;  %4067 = vmatpush1.bf16.msra.mxu1 %v5342_v53  ;;  %v5366_v58 = vld [vmem:[#allocation8 + $0x188] ss:$16 sps:$4 sm:$0xff]   ;;  %v5371_v53 = vld [vmem:[#allocation8 + $0x1ac] ss:$16 sps:$4 sm:$0xff]  }
 0x240   :  { %4068 = vmatprep.subr.bf16.mxu1 %v5350_v19  ;;  %v5396_v19 = vld [vmem:[#allocation8 + $0x260] ss:$16 sps:$4 sm:$0xff]  }
 0x242   :  { %2838 = vmatpush1.bf16.msra.mxu0 %v5279_v42  ;;  %v5404_v42 = vld [vmem:[#allocation8 + $0x284] ss:$16 sps:$4 sm:$0xff]  }
 0x243   :  { %2839 = vmatprep.subr.bf16.mxu0 %v5287_v63  ;;  %4069 = vmatpush1.bf16.msra.mxu1 %v5348_v6  ;;  %v5369_v63 = vld [vmem:[#allocation8 + $0x1a8] ss:$16 sps:$4 sm:$0xff]   ;;  %v5374_v6 = vld [vmem:[#allocation8 + $0x1cc] ss:$16 sps:$4 sm:$0xff]  }
 0x244   :  { %4070 = vmatprep.subr.bf16.mxu1 %v5356_v27  ;;  %v5402_v27 = vld [vmem:[#allocation8 + $0x280] ss:$16 sps:$4 sm:$0xff]  }
 0x246   :  { %2840 = vmatpush1.bf16.msra.mxu0 %v5285_v39  ;;  %v5410_v39 = vld [vmem:[#allocation8 + $0x2a4] ss:$16 sps:$4 sm:$0xff]  }
 0x247   :  { %2841 = vmatprep.subr.bf16.mxu0 %v5293_v48  ;;  %4071 = vmatpush1.bf16.msra.mxu1 %v5354_v5  ;;  %v5372_v48 = vld [vmem:[#allocation8 + $0x1c8] ss:$16 sps:$4 sm:$0xff]   ;;  %v5377_v5 = vld [vmem:[#allocation8 + $0x1ec] ss:$16 sps:$4 sm:$0xff]  }
 0x248   :  { %4081 = vmatprep.subr.bf16.mxu1 %v5380_v28  ;;  %v5408_v28 = vld [vmem:[#allocation8 + $0x2a0] ss:$16 sps:$4 sm:$0xff]  }
 0x24a   :  { %2842 = vmatpush1.bf16.msra.mxu0 %v5291_v33  ;;  %v5416_v33 = vld [vmem:[#allocation8 + $0x2c4] ss:$16 sps:$4 sm:$0xff]  }
 0x24b   :  { %2843 = vmatprep.subr.bf16.mxu0 %v5299_v14  ;;  %v5375_v14 = vld [vmem:[#allocation8 + $0x1e8] ss:$16 sps:$4 sm:$0xff]  }
 0x24e   :  { %2844 = vmatpush1.bf16.msra.mxu0 %v5297_v13  ;;  %v5383_v13 = vld [vmem:[#allocation8 + $0x20c] ss:$16 sps:$4 sm:$0xff]  }
 0x24f   :  { %4163 = vmatprep.subr.bf16.mxu0 %v5305_v26  ;;  %v5414_v26 = vld [vmem:[#allocation8 + $0x2c0] ss:$16 sps:$4 sm:$0xff]  }
 0x251   :  { %2846 = vmatmul.mubr.bf16.vlgmr.msra.gmra.mrb[4].mxu0 %v6118_v41  ;;  %v864_v41 = vsub.s32 1, %v6134_v11 }
 0x252   :  { %4164 = vmatpush1.bf16.msra.mxu0 %v5303_v32  ;;  %v5422_v32 = vld [vmem:[#allocation8 + $0x2e4] ss:$16 sps:$4 sm:$0xff]  }
 0x253   :  { %4165 = vmatprep.subr.bf16.mxu0 %v5311_v35  ;;  %v865_v21 = vrot.slane %v6137_v37, %v864_v41  ;;  %v5381_v35 = vld [vmem:[#allocation8 + $0x208] ss:$16 sps:$4 sm:$0xff]  }
 0x255   :  { %v2522_v0 = vadd.f32 %v6131_v55, %v865_v21  ;;  %v5359_v55 = vld [vmem:[#allocation8 + $0x12c] ss:$16 sps:$4 sm:$0xff]   ;;  %v5440_v21 = vld [vmem:[#allocation8 + $0x344] ss:$16 sps:$4 sm:$0xff]  }
 0x256   :  { %4166 = vmatpush1.bf16.msra.mxu0 %v5309_v51  ;;  %v5389_v51 = vld [vmem:[#allocation8 + $0x22c] ss:$16 sps:$4 sm:$0xff]  }
 0x257   :  { %4167 = vmatprep.subr.bf16.mxu0 %v5317_v36  ;;  %v5428_v36 = vld [vmem:[#allocation8 + $0x304] ss:$16 sps:$4 sm:$0xff]  }
 0x25a   :  { %4168 = vmatpush1.bf16.msra.mxu0 %v5315_v3  ;;  %v5387_v3 = vld [vmem:[#allocation8 + $0x228] ss:$16 sps:$4 sm:$0xff]  }
 0x25b   :  { %4169 = vmatprep.subr.bf16.mxu0 %v5323_v31  ;;  %v5395_v31 = vld [vmem:[#allocation8 + $0x24c] ss:$16 sps:$4 sm:$0xff]  }
 0x25e   :  { %4170 = vmatpush1.bf16.msra.mxu0 %v5321_v4  ;;  %v5426_v4 = vld [vmem:[#allocation8 + $0x300] ss:$16 sps:$4 sm:$0xff]  }
 0x25f   :  { %4171 = vmatprep.subr.bf16.mxu0 %v5329_v18  ;;  %v5434_v18 = vld [vmem:[#allocation8 + $0x324] ss:$16 sps:$4 sm:$0xff]  }
 0x262   :  { %4172 = vmatpush1.bf16.msra.mxu0 %v5327_v60  ;;  %v5393_v60 = vld [vmem:[#allocation8 + $0x248] ss:$16 sps:$4 sm:$0xff]  }
 0x263   :  { %4173 = vmatprep.subr.bf16.mxu0 %v5335_v57  ;;  %v5432_v57 = vld [vmem:[#allocation8 + $0x320] ss:$16 sps:$4 sm:$0xff]  }
 0x264   :  { %v2601_v1 = vpop.f32.mrb[0].mxu0 }
 0x265   :  { %v4788_v15 = vadd.f32 %v2601_v1, %v2520_v29  ;;  %v2603_v50 = vpop.f32.mrb[1].mxu0  ;;  %v5407_v29 = vld [vmem:[#allocation8 + $0x28c] ss:$16 sps:$4 sm:$0xff]   ;;  %v5405_v1 = vld [vmem:[#allocation8 + $0x288] ss:$16 sps:$4 sm:$0xff]  }
 0x266   :  { %v4790_v12 = vadd.f32 %v2603_v50, %v2522_v0  ;;  %v2605_v43 = vpop.f32.mrb[2].mxu0  ;;  %4174 = vmatpush1.bf16.msra.mxu0 %v5333_v56  ;;  %v5399_v56 = vld [vmem:[#allocation8 + $0x268] ss:$16 sps:$4 sm:$0xff]   ;;  %v5446_v0 = vld [vmem:[#allocation8 + $0x364] ss:$16 sps:$4 sm:$0xff]  }
 0x267   :  { %5570 = vtanh.f32 %v4788_v15  ;;  %v2606_v16 = vpop.f32.mrb[3].mxu0  ;;  %4175 = vmatprep.subr.bf16.mxu0 %v5341_v25  ;;  %v5438_v25 = vld [vmem:[#allocation8 + $0x340] ss:$16 sps:$4 sm:$0xff]   ;;  %v5413_v15 = vld [vmem:[#allocation8 + $0x2ac] ss:$16 sps:$4 sm:$0xff]  }
 0x268   :  { %5572 = vtanh.f32 %v4790_v12  ;;  %v5444_v50 = vld [vmem:[#allocation8 + $0x360] ss:$16 sps:$4 sm:$0xff]   ;;  %v5452_v12 = vld [vmem:[#allocation8 + $0x384] ss:$16 sps:$4 sm:$0xff]   ;;  %v5411_v43 = vld [vmem:[#allocation8 + $0x2a8] ss:$16 sps:$4 sm:$0xff]  }
 0x269   :  { %v5450_v16 = vld [vmem:[#allocation8 + $0x380] ss:$16 sps:$4 sm:$0xff]  }
 0x26a   :  { %4176 = vmatpush1.bf16.msra.mxu0 %v5339_v62  ;;  %v5419_v62 = vld [vmem:[#allocation8 + $0x2cc] ss:$16 sps:$4 sm:$0xff]  }
 0x26b   :  { %4177 = vmatprep.subr.bf16.mxu0 %v5347_v9  ;;  %v5458_v9 = vld [vmem:[#allocation8 + $0x3a4] ss:$16 sps:$4 sm:$0xff]  }
 0x26e   :  { %4178 = vmatpush1.bf16.msra.mxu0 %v5345_v40  ;;  %v5417_v40 = vld [vmem:[#allocation8 + $0x2c8] ss:$16 sps:$4 sm:$0xff]  }
 0x26f   :  { %4179 = vmatprep.subr.bf16.mxu0 %v5353_v7  ;;  %v5425_v7 = vld [vmem:[#allocation8 + $0x2ec] ss:$16 sps:$4 sm:$0xff]  }
 0x271   :  { %v5571_v59 = vpop.eup %5570 }
 0x272   :  { %v5573_v10 = vpop.eup %5572  ;;  %4180 = vmatpush1.bf16.msra.mxu0 %v5351_v34  ;;  %v2860_v49 = vpack.c.bf16 %v5571_v59, %v5571_v59  ;;  %v5456_v34 = vld [vmem:[#allocation8 + $0x3a0] ss:$16 sps:$4 sm:$0xff]   ;;  %v5423_v59 = vld [vmem:[#allocation8 + $0x2e8] ss:$16 sps:$4 sm:$0xff]  }
 0x273   :  { %v2861_v44 = vpack.c.bf16 %v5573_v10, %v5573_v10  ;;  %4181 = vmatprep.subr.bf16.mxu0 %v5359_v55  ;;  %v5464_v55 = vld [vmem:[#allocation8 + $0x3c4] ss:$16 sps:$4 sm:$0xff]   ;;  %v5431_v10 = vld [vmem:[#allocation8 + $0x30c] ss:$16 sps:$4 sm:$0xff]  }
 0x275   :  { %4072 = vmatprep.mubr.bf16.mxu1 %v2861_v44  ;;  %4195 = vmatprep.mubr.bf16.mxu0 %v2861_v44  ;;  %v5470_v44 = vld [vmem:[#allocation8 + $0x3e4] ss:$16 sps:$4 sm:$0xff]  }
 0x276   :  { %4073 = vmatmul.mubr.bf16.vlgmr.msra.gmra.mrb[8].mxu1 %v2860_v49  ;;  %4182 = vmatpush1.bf16.msra.mxu0 %v5357_v20  ;;  %v5462_v20 = vld [vmem:[#allocation8 + $0x3c0] ss:$16 sps:$4 sm:$0xff]  }
 0x277   :  { %4183 = vmatprep.subr.bf16.mxu0 %v5362_v22  ;;  %4082 = vmatpush1.bf16.msra.mxu1 %v5378_v17  ;;  %v5429_v22 = vld [vmem:[#allocation8 + $0x308] ss:$16 sps:$4 sm:$0xff]   ;;  %v5437_v17 = vld [vmem:[#allocation8 + $0x32c] ss:$16 sps:$4 sm:$0xff]  }
 0x278   :  { %4083 = vmatprep.subr.bf16.mxu1 %v5386_v23  ;;  %v5476_v23 = vld [vmem:[#allocation8 + $0x404] ss:$16 sps:$4 sm:$0xff]  }
 0x27a   :  { %4184 = vmatpush1.bf16.msra.mxu0 %v5360_v30  ;;  %v5435_v30 = vld [vmem:[#allocation8 + $0x328] ss:$16 sps:$4 sm:$0xff]  }
 0x27b   :  { %4185 = vmatprep.subr.bf16.mxu0 %v5365_v47  ;;  %4084 = vmatpush1.bf16.msra.mxu1 %v5384_v54  ;;  %v5443_v47 = vld [vmem:[#allocation8 + $0x34c] ss:$16 sps:$4 sm:$0xff]   ;;  %v5441_v54 = vld [vmem:[#allocation8 + $0x348] ss:$16 sps:$4 sm:$0xff]  }
 0x27c   :  { %4085 = vmatprep.subr.bf16.mxu1 %v5392_v8  ;;  %v5449_v8 = vld [vmem:[#allocation8 + $0x36c] ss:$16 sps:$4 sm:$0xff]  }
 0x27e   :  { %4186 = vmatpush1.bf16.msra.mxu0 %v5363_v52  ;;  %v5447_v52 = vld [vmem:[#allocation8 + $0x368] ss:$16 sps:$4 sm:$0xff]  }
 0x27f   :  { %4187 = vmatprep.subr.bf16.mxu0 %v5368_v61  ;;  %4086 = vmatpush1.bf16.msra.mxu1 %v5390_v45  ;;  %v5455_v61 = vld [vmem:[#allocation8 + $0x38c] ss:$16 sps:$4 sm:$0xff]   ;;  %v5453_v45 = vld [vmem:[#allocation8 + $0x388] ss:$16 sps:$4 sm:$0xff]  }
 0x280   :  { %4087 = vmatprep.subr.bf16.mxu1 %v5398_v2  ;;  %v5461_v2 = vld [vmem:[#allocation8 + $0x3ac] ss:$16 sps:$4 sm:$0xff]  }
 0x282   :  { %4188 = vmatpush1.bf16.msra.mxu0 %v5366_v58  ;;  %v5459_v58 = vld [vmem:[#allocation8 + $0x3a8] ss:$16 sps:$4 sm:$0xff]  }
 0x283   :  { %4189 = vmatprep.subr.bf16.mxu0 %v5371_v53  ;;  %4088 = vmatpush1.bf16.msra.mxu1 %v5396_v19  ;;  %v5467_v53 = vld [vmem:[#allocation8 + $0x3cc] ss:$16 sps:$4 sm:$0xff]   ;;  %v5465_v19 = vld [vmem:[#allocation8 + $0x3c8] ss:$16 sps:$4 sm:$0xff]  }
 0x284   :  { %4089 = vmatprep.subr.bf16.mxu1 %v5404_v42  ;;  %v5473_v42 = vld [vmem:[#allocation8 + $0x3ec] ss:$16 sps:$4 sm:$0xff]  }
 0x286   :  { %4190 = vmatpush1.bf16.msra.mxu0 %v5369_v63  ;;  %v5471_v63 = vld [vmem:[#allocation8 + $0x3e8] ss:$16 sps:$4 sm:$0xff]  }
 0x287   :  { %4191 = vmatprep.subr.bf16.mxu0 %v5374_v6  ;;  %4090 = vmatpush1.bf16.msra.mxu1 %v5402_v27  ;;  %v5479_v6 = vld [vmem:[#allocation8 + $0x40c] ss:$16 sps:$4 sm:$0xff]   ;;  %v868_v27 = vsub.s32 2, %v6134_v11 }
 0x288   :  { %4091 = vmatprep.subr.bf16.mxu1 %v5410_v39  ;;  %v872_v39 = vsub.s32 3, %v6134_v11 }
 0x28a   :  { %4192 = vmatpush1.bf16.msra.mxu0 %v5372_v48  ;;  %v869_v48 = vrot.slane %v6137_v37, %v868_v27 }
 0x28b   :  { %4193 = vmatprep.subr.bf16.mxu0 %v5377_v5  ;;  %4092 = vmatpush1.bf16.msra.mxu1 %v5408_v28  ;;  %v873_v5 = vrot.slane %v6137_v37, %v872_v39 }
 0x28c   :  { %4093 = vmatprep.subr.bf16.mxu1 %v5416_v33 }
 0x28e   :  { %4194 = vmatpush1.bf16.msra.mxu0 %v5375_v14 }
 0x28f   :  { %4204 = vmatprep.subr.bf16.mxu0 %v5383_v13  ;;  %4094 = vmatpush1.bf16.msra.mxu1 %v5414_v26 }
 0x290   :  { %4095 = vmatprep.subr.bf16.mxu1 %v5422_v32 }
 0x291   :  { %4196 = vmatmul.mubr.bf16.vlgmr.msra.gmra.mrb[8].mxu0 %v2860_v49  ;;  %v5468_v49 = vld [vmem:[#allocation8 + $0x3e0] ss:$16 sps:$4 sm:$0xff]  }
 0x292   :  { %4205 = vmatpush1.bf16.msra.mxu0 %v5381_v35 }
 0x293   :  { %4206 = vmatprep.subr.bf16.mxu0 %v5389_v51  ;;  %4096 = vmatpush1.bf16.msra.mxu1 %v5420_v46 }
 0x294   :  { %4097 = vmatprep.subr.bf16.mxu1 %v5428_v36  ;;  %v5474_v36 = vld [vmem:[#allocation8 + $0x400] ss:$16 sps:$4 sm:$0xff]  }
 0x296   :  { %4207 = vmatpush1.bf16.msra.mxu0 %v5387_v3  ;;  %v5477_v3 = vld [vmem:[#allocation8 + $0x408] ss:$16 sps:$4 sm:$0xff]  }
 0x297   :  { %4208 = vmatprep.subr.bf16.mxu0 %v5395_v31  ;;  %4098 = vmatpush1.bf16.msra.mxu1 %v5426_v4  ;;  %v5482_v4 = vld [vmem:[#allocation8 + $0x424] ss:$16 sps:$4 sm:$0xff]  }
 0x298   :  { %4099 = vmatprep.subr.bf16.mxu1 %v5434_v18  ;;  %v5485_v18 = vld [vmem:[#allocation8 + $0x42c] ss:$16 sps:$4 sm:$0xff]  }
 0x29a   :  { %4209 = vmatpush1.bf16.msra.mxu0 %v5393_v60  ;;  %v5480_v60 = vld [vmem:[#allocation8 + $0x420] ss:$16 sps:$4 sm:$0xff]  }
 0x29b   :  { %4210 = vmatprep.subr.bf16.mxu0 %v5401_v38  ;;  %4100 = vmatpush1.bf16.msra.mxu1 %v5432_v57  ;;  %v5483_v38 = vld [vmem:[#allocation8 + $0x428] ss:$16 sps:$4 sm:$0xff]   ;;  %v5488_v57 = vld [vmem:[#allocation8 + $0x444] ss:$16 sps:$4 sm:$0xff]  }
 0x29c   :  { %4101 = vmatprep.subr.bf16.mxu1 %v5440_v21  ;;  %v5491_v21 = vld [vmem:[#allocation8 + $0x44c] ss:$16 sps:$4 sm:$0xff]  }
 0x29e   :  { %4211 = vmatpush1.bf16.msra.mxu0 %v5399_v56  ;;  %v5486_v56 = vld [vmem:[#allocation8 + $0x440] ss:$16 sps:$4 sm:$0xff]  }
 0x29f   :  { %4212 = vmatprep.subr.bf16.mxu0 %v5407_v29  ;;  %4102 = vmatpush1.bf16.msra.mxu1 %v5438_v25  ;;  %v5489_v29 = vld [vmem:[#allocation8 + $0x448] ss:$16 sps:$4 sm:$0xff]   ;;  %v5494_v25 = vld [vmem:[#allocation8 + $0x464] ss:$16 sps:$4 sm:$0xff]  }
 0x2a0   :  { %4103 = vmatprep.subr.bf16.mxu1 %v5446_v0  ;;  %v5497_v0 = vld [vmem:[#allocation8 + $0x46c] ss:$16 sps:$4 sm:$0xff]  }
 0x2a2   :  { %4213 = vmatpush1.bf16.msra.mxu0 %v5405_v1  ;;  %v5492_v1 = vld [vmem:[#allocation8 + $0x460] ss:$16 sps:$4 sm:$0xff]  }
 0x2a3   :  { %4214 = vmatprep.subr.bf16.mxu0 %v5413_v15  ;;  %4104 = vmatpush1.bf16.msra.mxu1 %v5444_v50  ;;  %v5495_v15 = vld [vmem:[#allocation8 + $0x468] ss:$16 sps:$4 sm:$0xff]   ;;  %v5500_v50 = vld [vmem:[#allocation8 + $0x484] ss:$16 sps:$4 sm:$0xff]  }
 0x2a4   :  { %4105 = vmatprep.subr.bf16.mxu1 %v5452_v12  ;;  %v5503_v12 = vld [vmem:[#allocation8 + $0x48c] ss:$16 sps:$4 sm:$0xff]  }
 0x2a6   :  { %4215 = vmatpush1.bf16.msra.mxu0 %v5411_v43  ;;  %v5498_v43 = vld [vmem:[#allocation8 + $0x480] ss:$16 sps:$4 sm:$0xff]  }
 0x2a7   :  { %4216 = vmatprep.subr.bf16.mxu0 %v5419_v62  ;;  %4106 = vmatpush1.bf16.msra.mxu1 %v5450_v16  ;;  %v5501_v62 = vld [vmem:[#allocation8 + $0x488] ss:$16 sps:$4 sm:$0xff]   ;;  %v5506_v16 = vld [vmem:[#allocation8 + $0x4a4] ss:$16 sps:$4 sm:$0xff]  }
 0x2a8   :  { %4107 = vmatprep.subr.bf16.mxu1 %v5458_v9  ;;  %v5509_v9 = vld [vmem:[#allocation8 + $0x4ac] ss:$16 sps:$4 sm:$0xff]  }
 0x2aa   :  { %4217 = vmatpush1.bf16.msra.mxu0 %v5417_v40  ;;  %v5504_v40 = vld [vmem:[#allocation8 + $0x4a0] ss:$16 sps:$4 sm:$0xff]  }
 0x2ab   :  { %4218 = vmatprep.subr.bf16.mxu0 %v5425_v7  ;;  %4108 = vmatpush1.bf16.msra.mxu1 %v5456_v34  ;;  %v5507_v7 = vld [vmem:[#allocation8 + $0x4a8] ss:$16 sps:$4 sm:$0xff]   ;;  %v5512_v34 = vld [vmem:[#allocation8 + $0x4c4] ss:$16 sps:$4 sm:$0xff]  }
 0x2ac   :  { %4109 = vmatprep.subr.bf16.mxu1 %v5464_v55  ;;  %v5515_v55 = vld [vmem:[#allocation8 + $0x4cc] ss:$16 sps:$4 sm:$0xff]  }
 0x2ae   :  { %4219 = vmatpush1.bf16.msra.mxu0 %v5423_v59  ;;  %v5510_v59 = vld [vmem:[#allocation8 + $0x4c0] ss:$16 sps:$4 sm:$0xff]  }
 0x2af   :  { %4220 = vmatprep.subr.bf16.mxu0 %v5431_v10  ;;  %4110 = vmatpush1.bf16.msra.mxu1 %v5462_v20  ;;  %v5513_v10 = vld [vmem:[#allocation8 + $0x4c8] ss:$16 sps:$4 sm:$0xff]   ;;  %v5518_v20 = vld [vmem:[#allocation8 + $0x4e4] ss:$16 sps:$4 sm:$0xff]  }
 0x2b0   :  { %4111 = vmatprep.subr.bf16.mxu1 %v5470_v44  ;;  %v5521_v44 = vld [vmem:[#allocation8 + $0x4ec] ss:$16 sps:$4 sm:$0xff]  }
 0x2b2   :  { %4221 = vmatpush1.bf16.msra.mxu0 %v5429_v22  ;;  %v5516_v22 = vld [vmem:[#allocation8 + $0x4e0] ss:$16 sps:$4 sm:$0xff]  }
 0x2b3   :  { %4222 = vmatprep.subr.bf16.mxu0 %v5437_v17  ;;  %4112 = vmatpush1.bf16.msra.mxu1 %v5468_v49  ;;  %v5519_v17 = vld [vmem:[#allocation8 + $0x4e8] ss:$16 sps:$4 sm:$0xff]   ;;  %v5524_v49 = vld [vmem:[#allocation8 + $0x504] ss:$16 sps:$4 sm:$0xff]  }
 0x2b4   :  { %4122 = vmatprep.subr.bf16.mxu1 %v5476_v23  ;;  %v5527_v23 = vld [vmem:[#allocation8 + $0x50c] ss:$16 sps:$4 sm:$0xff]  }
 0x2b6   :  { %4223 = vmatpush1.bf16.msra.mxu0 %v5435_v30  ;;  %v5522_v30 = vld [vmem:[#allocation8 + $0x500] ss:$16 sps:$4 sm:$0xff]  }
 0x2b7   :  { %4224 = vmatprep.subr.bf16.mxu0 %v5443_v47  ;;  %v5525_v47 = vld [vmem:[#allocation8 + $0x508] ss:$16 sps:$4 sm:$0xff]  }
 0x2ba   :  { %4225 = vmatpush1.bf16.msra.mxu0 %v5441_v54  ;;  %v5530_v54 = vld [vmem:[#allocation8 + $0x524] ss:$16 sps:$4 sm:$0xff]  }
 0x2bb   :  { %4226 = vmatprep.subr.bf16.mxu0 %v5449_v8  ;;  %v5533_v8 = vld [vmem:[#allocation8 + $0x52c] ss:$16 sps:$4 sm:$0xff]  }
 0x2be   :  { %4227 = vmatpush1.bf16.msra.mxu0 %v5447_v52  ;;  %v5528_v52 = vld [vmem:[#allocation8 + $0x520] ss:$16 sps:$4 sm:$0xff]  }
 0x2bf   :  { %4228 = vmatprep.subr.bf16.mxu0 %v5455_v61  ;;  %v5531_v61 = vld [vmem:[#allocation8 + $0x528] ss:$16 sps:$4 sm:$0xff]  }
 0x2c2   :  { %4229 = vmatpush1.bf16.msra.mxu0 %v5453_v45  ;;  %v5536_v45 = vld [vmem:[#allocation8 + $0x544] ss:$16 sps:$4 sm:$0xff]  }
 0x2c3   :  { %4230 = vmatprep.subr.bf16.mxu0 %v5461_v2  ;;  %v5539_v2 = vld [vmem:[#allocation8 + $0x54c] ss:$16 sps:$4 sm:$0xff]  }
 0x2c6   :  { %4231 = vmatpush1.bf16.msra.mxu0 %v5459_v58  ;;  %v5534_v58 = vld [vmem:[#allocation8 + $0x540] ss:$16 sps:$4 sm:$0xff]  }
 0x2c7   :  { %4232 = vmatprep.subr.bf16.mxu0 %v5467_v53  ;;  %v5537_v53 = vld [vmem:[#allocation8 + $0x548] ss:$16 sps:$4 sm:$0xff]  }
 0x2ca   :  { %4233 = vmatpush1.bf16.msra.mxu0 %v5465_v19  ;;  %v5542_v19 = vld [vmem:[#allocation8 + $0x564] ss:$16 sps:$4 sm:$0xff]  }
 0x2cb   :  { %4234 = vmatprep.subr.bf16.mxu0 %v5473_v42  ;;  %v5545_v42 = vld [vmem:[#allocation8 + $0x56c] ss:$16 sps:$4 sm:$0xff]  }
 0x2ce   :  { %4235 = vmatpush1.bf16.msra.mxu0 %v5471_v63  ;;  %v5540_v63 = vld [vmem:[#allocation8 + $0x560] ss:$16 sps:$4 sm:$0xff]  }
 0x2cf   :  { %4245 = vmatprep.subr.bf16.mxu0 %v5479_v6  ;;  %v5543_v6 = vld [vmem:[#allocation8 + $0x568] ss:$16 sps:$4 sm:$0xff]  }
 0x2dd   :  { %v2724_v28 = vpop.f32.mrb[4].mxu1 }
 0x2de   :  { %v4791_v33 = vadd.f32 %v2724_v28, %v869_v48  ;;  %v2726_v14 = vpop.f32.mrb[5].mxu1  ;;  %v5548_v48 = vld [vmem:[#allocation8 + $0x584] ss:$16 sps:$4 sm:$0xff]   ;;  %v876_v28 = vsub.s32 4, %v6134_v11 }
 0x2df   :  { %v4792_v13 = vadd.f32 %v2726_v14, %v873_v5  ;;  %v2728_v26 = vpop.f32.mrb[6].mxu1  ;;  %v5551_v5 = vld [vmem:[#allocation8 + $0x58c] ss:$16 sps:$4 sm:$0xff]   ;;  %v5549_v14 = vld [vmem:[#allocation8 + $0x588] ss:$16 sps:$4 sm:$0xff]  }
 0x2e0   :  { %5574 = vtanh.f32 %v4791_v33  ;;  %v2729_v32 = vpop.f32.mrb[7].mxu1  ;;  %v5546_v33 = vld [vmem:[#allocation8 + $0x580] ss:$16 sps:$4 sm:$0xff]   ;;  %v5554_v26 = vld [vmem:[#allocation8 + $0x5a4] ss:$16 sps:$4 sm:$0xff]  }
 0x2e1   :  { %5576 = vtanh.f32 %v4792_v13  ;;  %v880_v13 = vsub.s32 5, %v6134_v11  ;;  %v5557_v32 = vld [vmem:[#allocation8 + $0x5ac] ss:$16 sps:$4 sm:$0xff]  }
 0x2ea   :  { %v5575_v35 = vpop.eup %5574 }
 0x2eb   :  { %v5577_v51 = vpop.eup %5576  ;;  %v2862_v31 = vpack.c.bf16 %v5575_v35, %v5575_v35  ;;  %v877_v35 = vrot.slane %v6137_v37, %v876_v28 }
 0x2ec   :  { %v2863_v46 = vpack.c.bf16 %v5577_v51, %v5577_v51  ;;  %v5552_v51 = vld [vmem:[#allocation8 + $0x5a0] ss:$16 sps:$4 sm:$0xff]  }
 0x2ee   :  { %4113 = vmatprep.mubr.bf16.mxu1 %v2863_v46  ;;  %4236 = vmatprep.mubr.bf16.mxu0 %v2863_v46  ;;  %v5555_v46 = vld [vmem:[#allocation8 + $0x5a8] ss:$16 sps:$4 sm:$0xff]  }
 0x2ef   :  { %4114 = vmatmul.mubr.bf16.vlgmr.msra.gmra.mrb[8].mxu1 %v2862_v31  ;;  %4237 = vmatmul.mubr.bf16.vlgmr.msra.gmra.mrb[8].mxu0 %v2862_v31  ;;  %v5563_v31 = vld [vmem:[#allocation8 + $0x5cc] ss:$16 sps:$4 sm:$0xff]  }
 0x2f0   :  { %4123 = vmatpush1.bf16.msra.mxu1 %v5474_v36  ;;  %4246 = vmatpush1.bf16.msra.mxu0 %v5477_v3  ;;  %v881_v36 = vrot.slane %v6137_v37, %v880_v13  ;;  %v5560_v3 = vld [vmem:[#allocation8 + $0x5c4] ss:$16 sps:$4 sm:$0xff]   ;;  %v5564_v37 = vld [vmem:[#allocation8 + $0x5e0] ss:$16 sps:$4 sm:$0xff]  }
 0x2f1   :  { %4124 = vmatprep.subr.bf16.mxu1 %v5482_v4  ;;  %4247 = vmatprep.subr.bf16.mxu0 %v5485_v18 }
 0x2f4   :  { %4125 = vmatpush1.bf16.msra.mxu1 %v5480_v60  ;;  %4248 = vmatpush1.bf16.msra.mxu0 %v5483_v38  ;;  %v5558_v38 = vld [vmem:[#allocation8 + $0x5c0] ss:$16 sps:$4 sm:$0xff]  }
 0x2f5   :  { %4126 = vmatprep.subr.bf16.mxu1 %v5488_v57  ;;  %4249 = vmatprep.subr.bf16.mxu0 %v5491_v21  ;;  %v5561_v57 = vld [vmem:[#allocation8 + $0x5c8] ss:$16 sps:$4 sm:$0xff]  }
 0x2f8   :  { %4127 = vmatpush1.bf16.msra.mxu1 %v5486_v56  ;;  %4250 = vmatpush1.bf16.msra.mxu0 %v5489_v29  ;;  %v5566_v29 = vld [vmem:[#allocation8 + $0x5e4] ss:$16 sps:$4 sm:$0xff]  }
 0x2f9   :  { %4128 = vmatprep.subr.bf16.mxu1 %v5494_v25  ;;  %4251 = vmatprep.subr.bf16.mxu0 %v5497_v0  ;;  %v5569_v25 = vld [vmem:[#allocation8 + $0x5ec] ss:$16 sps:$4 sm:$0xff]  }
 0x2fc   :  { %4129 = vmatpush1.bf16.msra.mxu1 %v5492_v1  ;;  %4252 = vmatpush1.bf16.msra.mxu0 %v5495_v15  ;;  %v5567_v1 = vld [vmem:[#allocation8 + $0x5e8] ss:$16 sps:$4 sm:$0xff]  }
 0x2fd   :  { %4130 = vmatprep.subr.bf16.mxu1 %v5500_v50  ;;  %4253 = vmatprep.subr.bf16.mxu0 %v5503_v12 }
 0x300   :  { %4131 = vmatpush1.bf16.msra.mxu1 %v5498_v43  ;;  %4254 = vmatpush1.bf16.msra.mxu0 %v5501_v62  ;;  %v3058_v62 = vld [vmem:[#allocation10] sm:$0xf] }
 0x301   :  { %4132 = vmatprep.subr.bf16.mxu1 %v5506_v16  ;;  %4255 = vmatprep.subr.bf16.mxu0 %v5509_v9  ;;  %v3063_v16 = vrot.slane %v3058_v62, %v860_v24  ;;  %v3071_v9 = vrot.slane %v3058_v62, %v868_v27 }
 0x304   :  { %4133 = vmatpush1.bf16.msra.mxu1 %v5504_v40  ;;  %4256 = vmatpush1.bf16.msra.mxu0 %v5507_v7  ;;  %v3067_v40 = vrot.slane %v3058_v62, %v864_v41  ;;  %v3075_v7 = vrot.slane %v3058_v62, %v872_v39 }
 0x305   :  { %4134 = vmatprep.subr.bf16.mxu1 %v5512_v34  ;;  %4257 = vmatprep.subr.bf16.mxu0 %v5515_v55 }
 0x308   :  { %4135 = vmatpush1.bf16.msra.mxu1 %v5510_v59  ;;  %4258 = vmatpush1.bf16.msra.mxu0 %v5513_v10 }
 0x309   :  { %4136 = vmatprep.subr.bf16.mxu1 %v5518_v20  ;;  %4259 = vmatprep.subr.bf16.mxu0 %v5521_v44 }
 0x30c   :  { %4137 = vmatpush1.bf16.msra.mxu1 %v5516_v22  ;;  %4260 = vmatpush1.bf16.msra.mxu0 %v5519_v17 }
 0x30d   :  { %4138 = vmatprep.subr.bf16.mxu1 %v5524_v49  ;;  %4261 = vmatprep.subr.bf16.mxu0 %v5527_v23 }
 0x310   :  { %4139 = vmatpush1.bf16.msra.mxu1 %v5522_v30  ;;  %4262 = vmatpush1.bf16.msra.mxu0 %v5525_v47 }
 0x311   :  { %4140 = vmatprep.subr.bf16.mxu1 %v5530_v54  ;;  %4263 = vmatprep.subr.bf16.mxu0 %v5533_v8 }
 0x314   :  { %4141 = vmatpush1.bf16.msra.mxu1 %v5528_v52  ;;  %4264 = vmatpush1.bf16.msra.mxu0 %v5531_v61 }
 0x315   :  { %4142 = vmatprep.subr.bf16.mxu1 %v5536_v45  ;;  %4265 = vmatprep.subr.bf16.mxu0 %v5539_v2 }
 0x318   :  { %4143 = vmatpush1.bf16.msra.mxu1 %v5534_v58  ;;  %4266 = vmatpush1.bf16.msra.mxu0 %v5537_v53 }
 0x319   :  { %4144 = vmatprep.subr.bf16.mxu1 %v5542_v19  ;;  %4267 = vmatprep.subr.bf16.mxu0 %v5545_v42 }
 0x31c   :  { %4145 = vmatpush1.bf16.msra.mxu1 %v5540_v63  ;;  %4268 = vmatpush1.bf16.msra.mxu0 %v5543_v6 }
 0x31d   :  { %4146 = vmatprep.subr.bf16.mxu1 %v5548_v48  ;;  %4269 = vmatprep.subr.bf16.mxu0 %v5551_v5 }
 0x320   :  { %4147 = vmatpush1.bf16.msra.mxu1 %v5546_v33  ;;  %4270 = vmatpush1.bf16.msra.mxu0 %v5549_v14 }
 0x321   :  { %4148 = vmatprep.subr.bf16.mxu1 %v5554_v26  ;;  %4271 = vmatprep.subr.bf16.mxu0 %v5557_v32 }
 0x324   :  { %v2847_v4 = vpop.f32.mrb[4].mxu0  ;;  %4149 = vmatpush1.bf16.msra.mxu1 %v5552_v51  ;;  %4272 = vmatpush1.bf16.msra.mxu0 %v5555_v46 }
 0x325   :  { %v4793_v18 = vadd.f32 %v2847_v4, %v877_v35  ;;  %v2849_v60 = vpop.f32.mrb[5].mxu0  ;;  %4150 = vmatprep.subr.bf16.mxu1 %v5560_v3  ;;  %4273 = vmatprep.subr.bf16.mxu0 %v5563_v31 }
 0x326   :  { %v4794_v21 = vadd.f32 %v2849_v60, %v881_v36  ;;  %v2851_v56 = vpop.f32.mrb[6].mxu0 }
 0x327   :  { %5578 = vtanh.f32 %v4793_v18  ;;  %v2852_v0 = vpop.f32.mrb[7].mxu0 }
 0x328   :  { %5580 = vtanh.f32 %v4794_v21  ;;  %4151 = vmatpush1.bf16.msra.mxu1 %v5558_v38  ;;  %4274 = vmatpush1.bf16.msra.mxu0 %v5561_v57 }
 0x329   :  { %4152 = vmatprep.subr.bf16.mxu1 %v5566_v29  ;;  %4275 = vmatprep.subr.bf16.mxu0 %v5569_v25 }
 0x32c   :  { %4153 = vmatpush1.bf16.msra.mxu1 %v5564_v37  ;;  %4276 = vmatpush1.bf16.msra.mxu0 %v5567_v1 }
 0x331   :  { %v5579_v15 = vpop.eup %5578 }
 0x332   :  { %v5581_v50 = vpop.eup %5580  ;;  %v2864_v43 = vpack.c.bf16 %v5579_v15, %v5579_v15 }
 0x333   :  { %v2865_v12 = vpack.c.bf16 %v5581_v50, %v5581_v50 }
 0x335   :  { %4154 = vmatprep.mubr.bf16.mxu1 %v2865_v12  ;;  %4277 = vmatprep.mubr.bf16.mxu0 %v2865_v12 }
 0x336   :  { %4155 = vmatmul.mubr.bf16.vlgmr.msra.gmra.mrb[8].mxu1 %v2864_v43  ;;  %4278 = vmatmul.mubr.bf16.vlgmr.msra.gmra.mrb[8].mxu0 %v2864_v43 }
 0x409   :  { %v4156_v34 = vpop.f32.mrb[8].mxu1  ;;  %v4279_v55 = vpop.f32.mrb[8].mxu0 }
 0x40a   :  { %v4795_v59 = vadd.f32 %v4156_v34, %v3063_v16  ;;  %v4797_v10 = vadd.f32 %v4279_v55, %v3071_v9  ;;  %v4158_v20 = vpop.f32.mrb[9].mxu1  ;;  %v4281_v44 = vpop.f32.mrb[9].mxu0 }
 0x40b   :  { %v4796_v22 = vadd.f32 %v4158_v20, %v3067_v40  ;;  %v4798_v17 = vadd.f32 %v4281_v44, %v3075_v7  ;;  %v4160_v24 = vpop.f32.mrb[10].mxu1  ;;  %v4283_v49 = vpop.f32.mrb[10].mxu0 }
 0x40c   :  { %4286 = vst [vmem:[#allocation11] sm:$0xff] %v4795_v59  ;;  %4288 = vst [vmem:[#allocation11 + $0x10] sm:$0xff] %v4797_v10  ;;  %v4161_v27 = vpop.f32.mrb[11].mxu1  ;;  %v4284_v41 = vpop.f32.mrb[11].mxu0 }
 0x40d   :  { %4287 = vst [vmem:[#allocation11 + $0x8] sm:$0xff] %v4796_v22  ;;  %4289 = vst [vmem:[#allocation11 + $0x18] sm:$0xff] %v4798_v17 }
 0x40e   :  { %5703 = shalt.err (!%p5700_p2)
}
 0x40f   :  { %s5704_s26 = scalar_lea.hbm %s6186_s6, 512 }
 0x410   :  { %p5705_p3 = scmp.ne.s32.totalorder %s6186_s6, %s5704_s26  ;;  %p5708_p4 = scmp.lt.u32.totalorder %s5704_s26, %s6186_s6 }
 0x412   :  { %p5710_p5 = pnand %p5708_p4, %p5705_p3 }
 0x414   :  { %5713 = shalt.err (!%p5710_p5)
}
 0x415   :  { %4299 = dma.vmem_to_hbm [thread:$0]  %s4297_s0, 512, %s6186_s6, [#allocation4]  }
 0x416   :  { %5720 = dma.done.wait [#allocation4], 512  }
 0x417   :  { %5721 = vsyncadd [#allocation4], 4294966784 }
 0x418   :  { %4303 = vsyncpa [#allocation3], 1 }
 0x419   :  { %4304 = vsyncpa [#allocation6], 1 }
 0x41a   :  { %4305 = vsyncpa [#allocation9], 1 }
 0x41b   :  { %4306 = vsyncpa [#allocation4], 1 }

</bundles_post_ra>
